<compile_context>
chip_gen: v5e
topology: v5e:2x2
jax: 0.10.0
libtpu: 0.0.40
codegen_flags: <defaults>
</compile_context>

<pallas_src>
from math import sqrt
import functools

import jax
import jax.numpy as jnp
from jax.experimental import pallas as pl
from jax.experimental.pallas import tpu as pltpu


# TODO(synk): mask/masked_fill path not implemented — the module's forward
# always calls scaled_dot_product with mask=None, so it is unused here.
def _mha_kernel(x_ref, inp_ref, wx_ref, wi_ref, bqkv_ref, wo_ref, bo_ref,
                *refs, num_heads, head_dim_p, mxu_dtype, with_attn, attn_flat):
    if with_attn:
        o_ref, attn_ref, slab_ref = refs
    else:
        o_ref, slab_ref = refs
        attn_ref = None

    TB, S, dx = x_ref.shape
    di = inp_ref.shape[-1]
    H, hdp = num_heads, head_dim_p
    Ep = H * hdp
    E = o_ref.shape[-1]
    R = TB * S

    # Flatten (TB, S) -> rows so the projection matmuls have a large M dim.
    x2 = x_ref[...].reshape(R, dx).astype(mxu_dtype)
    i2 = inp_ref[...].reshape(R, di).astype(mxu_dtype)

    # Concat-free QKV projection: x @ Wx + input @ Wi + b.  Columns are already
    # laid out as [Q | K | V] slabs, head-major, each head zero-padded to hdp
    # (multiple of 128) lanes; 1/sqrt(head_dim) is folded into the Q slab.
    # bf16 operands on the MXU, f32 accumulation, f32 bias.
    qkv = (jnp.dot(x2, wx_ref[...], preferred_element_type=jnp.float32)
           + jnp.dot(i2, wi_ref[...], preferred_element_type=jnp.float32)
           + bqkv_ref[...])                                  # (R, 3*Ep) f32

    for h in range(H):                       # small static loop over heads
        qh = qkv[:, h * hdp:(h + 1) * hdp].astype(mxu_dtype).reshape(TB, S, hdp)
        kh = (qkv[:, Ep + h * hdp:Ep + (h + 1) * hdp]
              .astype(mxu_dtype).reshape(TB, S, hdp))
        vh = (qkv[:, 2 * Ep + h * hdp:2 * Ep + (h + 1) * hdp]
              .astype(mxu_dtype).reshape(TB, S, hdp))

        # TB-batched scaled dot-product attention (scale already folded into Q;
        # the zero-padded lanes contribute exactly nothing to the contraction).
        logits = jnp.einsum('bqd,bkd->bqk', qh, kh,
                            preferred_element_type=jnp.float32)  # (TB,S,S) f32
        m = jnp.max(logits, axis=-1, keepdims=True)
        p = jnp.exp(logits - m)                                  # f32 softmax
        attn = p * pl.reciprocal(jnp.sum(p, axis=-1, keepdims=True), approx=True)

        if with_attn:
            if attn_flat:
                # Lane-dense (TB, 1, H*S*S) slab writeback (no masked vst /
                # strided HBM DMA for S < 128).
                attn_ref[:, 0, h * S * S:(h + 1) * S * S] = (
                    attn.reshape(TB, S * S).astype(attn_ref.dtype))
            else:
                attn_ref[:, h] = attn.astype(attn_ref.dtype)

        hv = jnp.einsum('bqk,bkd->bqd', attn.astype(mxu_dtype), vh,
                        preferred_element_type=jnp.float32)      # (TB, S, hdp)
        # Lane-aligned write of this head's values into the deferred-projection
        # slab (replaces H small per-head matmuls with K = head_dim).
        slab_ref[:, h * hdp:(h + 1) * hdp] = (
            hv.reshape(R, hdp).astype(slab_ref.dtype))

    # One full-contraction output projection: (R, Ep) @ (Ep, E).
    o = jnp.dot(slab_ref[...], wo_ref[...],
                preferred_element_type=jnp.float32) + bo_ref[...]
    o_ref[...] = o.reshape(TB, S, E).astype(o_ref.dtype)


def prepare_mha_params(wqkv_t, bqkv, wo_t, bo, *, num_heads, input_dim,
                       mxu_dtype=jnp.bfloat16):
    """One-time weight re-layout (hoisted out of the per-call path).

    wqkv_t : (input_dim + orig_inp_dim, 3*embed_dim)  transposed qkv_proj weight
    bqkv   : (3*embed_dim,) or (1, 3*embed_dim)
    wo_t   : (embed_dim, embed_dim)                   transposed o_proj weight
    bo     : (embed_dim,) or (1, embed_dim)
    """
    dcat = wqkv_t.shape[0]
    E = wo_t.shape[0]
    H = num_heads
    hd = E // H
    hdp = -(-hd // 128) * 128           # pad head_dim up to a multiple of 128 lanes
    Ep = H * hdp
    dx, di = input_dim, dcat - input_dim
    scale = 1.0 / sqrt(hd)

    # Original column c of wqkv_t is (h = c//(3hd), t = (c%(3hd))//hd, d = c%hd).
    # Re-order to (t, h, d): contiguous [Q | K | V] slabs, head-major inside each
    # slab, each head zero-padded to hdp lanes; fold 1/sqrt(hd) into the Q slab.
    w = wqkv_t.reshape(dcat, H, 3, hd).transpose(0, 2, 1, 3)     # (dcat, 3, H, hd)
    b = jnp.reshape(bqkv, (H, 3, hd)).transpose(1, 0, 2)         # (3, H, hd)
    w = w.at[:, 0].multiply(scale)
    b = b.at[0].multiply(scale)
    if hdp != hd:
        w = jnp.pad(w, ((0, 0), (0, 0), (0, 0), (0, hdp - hd)))
        b = jnp.pad(b, ((0, 0), (0, 0), (0, hdp - hd)))
    w = w.reshape(dcat, 3 * Ep)
    wx = w[:dx].astype(mxu_dtype)       # split contraction rows: no in-kernel concat
    wi = w[dx:].astype(mxu_dtype)
    bq = b.reshape(1, 3 * Ep).astype(jnp.float32)

    # Output projection: per-head row slabs, zero-padded to hdp rows, flattened
    # to (Ep, E) so they match the padded value slab of the deferred projection.
    wo = wo_t.reshape(H, hd, E)
    if hdp != hd:
        wo = jnp.pad(wo, ((0, 0), (0, hdp - hd), (0, 0)))
    wo = wo.reshape(Ep, E).astype(mxu_dtype)
    bo2 = jnp.reshape(bo, (1, E)).astype(jnp.float32)

    return dict(wx=wx, wi=wi, bqkv=bq, wo=wo, bo=bo2, num_heads=H, embed_dim=E,
                head_dim=hd, head_dim_p=hdp, input_dim=dx, orig_inp_dim=di,
                mxu_dtype=mxu_dtype)


def _vmem_budget():
    """Generation-aware VMEM budget (v7x: 64 MiB/TC; v5e/v6e: 128 MiB)."""
    cap = 64 << 20                       # conservative fallback (v7x per-core)
    try:
        cap = int(getattr(pltpu.get_tpu_info(), "vmem_capacity_bytes", cap))
    except Exception:
        pass
    budget = min(int(cap * 0.65), 96 << 20)   # ~42 MiB on v7x, ~83 MiB on v5e/v6e
    limit = min(int(cap * 0.85), 112 << 20)
    return budget, limit


def _pick_tb(B, S, dx, di, E, H, hdp, in_bytes, out_bytes, attn_bytes, w_bytes,
             with_attn, budget_bytes):
    """Largest divisor of B (capped at B//2 so the grid keeps >= 2 steps for
    megacore/v7x sharding) whose double-buffered blocked I/O + single-buffered
    weights + in-kernel f32 temporaries fit the VMEM budget."""
    Ep = H * hdp
    weights = w_bytes * ((dx + di) * 3 * Ep + Ep * E) + 4 * (3 * Ep + E)
    max_tb = max(1, B // 2)
    best = 1
    for tb in range(1, max_tb + 1):
        if B % tb:
            continue
        R = tb * S
        io = R * (dx + di) * in_bytes + R * E * out_bytes       # x, input, o blocks
        if with_attn:
            io += tb * H * S * S * attn_bytes                   # attention block
        temps = (R * 3 * Ep * 4                                 # qkv (f32)
                 + R * Ep * w_bytes                             # value-slab scratch
                 + 3 * tb * S * S * 4                           # logits / p / attn
                 + 3 * R * hdp * w_bytes + R * hdp * 4)         # qh/kh/vh + hv
        if weights + 2 * io + temps <= budget_bytes:            # I/O double-buffered
            best = tb
    return best


# Flipped to False if this JAX/Mosaic build rejects single-buffered constants.
_SINGLE_BUFFER_CONSTS = [True]


def multihead_attention_my(x, inp, params, *, attn_dtype=jnp.float32,
                           return_attention=True):
    """Pallas implementation of MultiheadAttentionMY.forward (mask is None).

    x      : (B, S, input_dim),  inp : (B, S, orig_inp_dim)
    params : output of prepare_mha_params (precompute once per parameter set)
    Returns (o, attention) with o: (B, S, embed_dim), attention:
    (B, num_heads, S, S) in attn_dtype — or just o if return_attention=False
    (drops the dominant attention-map HBM writeback).  Pass
    attn_dtype=jnp.bfloat16 to halve that writeback.
    """
    B, S, dx = x.shape
    di = inp.shape[-1]
    assert dx == params["input_dim"] and di == params["orig_inp_dim"]
    H = params["num_heads"]
    E = params["embed_dim"]
    hdp = params["head_dim_p"]
    Ep = H * hdp
    mxu_dtype = params["mxu_dtype"]

    in_bytes = jnp.dtype(x.dtype).itemsize
    out_bytes = jnp.dtype(x.dtype).itemsize
    attn_bytes = jnp.dtype(attn_dtype).itemsize
    w_bytes = jnp.dtype(mxu_dtype).itemsize
    budget, vmem_limit = _vmem_budget()
    TB = _pick_tb(B, S, dx, di, E, H, hdp, in_bytes, out_bytes, attn_bytes,
                  w_bytes, return_attention, budget)
    grid = (B // TB,)

    # Lane-dense attention writeback: if S is not a multiple of 128, emit a
    # (B, 1, H*S*S) slab and reshape to (B, H, S, S) afterwards (free: metadata).
    attn_flat = return_attention and (S % 128 != 0)

    kernel = functools.partial(
        _mha_kernel, num_heads=H, head_dim_p=hdp, mxu_dtype=mxu_dtype,
        with_attn=return_attention, attn_flat=attn_flat)

    out_shape = [jax.ShapeDtypeStruct((B, S, E), x.dtype)]
    out_specs = [pl.BlockSpec((TB, S, E), lambda g: (g, 0, 0))]
    if return_attention:
        if attn_flat:
            out_shape.append(jax.ShapeDtypeStruct((B, 1, H * S * S), attn_dtype))
            out_specs.append(pl.BlockSpec((TB, 1, H * S * S), lambda g: (g, 0, 0)))
        else:
            out_shape.append(jax.ShapeDtypeStruct((B, H, S, S), attn_dtype))
            out_specs.append(pl.BlockSpec((TB, H, S, S), lambda g: (g, 0, 0, 0)))

    def _run(single_buffer_consts):
        if single_buffer_consts:
            const = dict(pipeline_mode=pl.Buffered(1))   # constant operands:
        else:                                            # no double-buffering
            const = {}
        in_specs = [
            pl.BlockSpec((TB, S, dx), lambda g: (g, 0, 0)),
            pl.BlockSpec((TB, S, di), lambda g: (g, 0, 0)),
            pl.BlockSpec((dx, 3 * Ep), lambda g: (0, 0), **const),
            pl.BlockSpec((di, 3 * Ep), lambda g: (0, 0), **const),
            pl.BlockSpec((1, 3 * Ep), lambda g: (0, 0), **const),
            pl.BlockSpec((Ep, E), lambda g: (0, 0), **const),
            pl.BlockSpec((1, E), lambda g: (0, 0), **const),
        ]
        grid_spec = pltpu.PrefetchScalarGridSpec(
            num_scalar_prefetch=0,
            grid=grid,
            in_specs=in_specs,
            out_specs=out_specs,
            scratch_shapes=[pltpu.VMEM((TB * S, Ep), mxu_dtype)],
        )
        return pl.pallas_call(
            kernel,
            out_shape=tuple(out_shape),
            grid_spec=grid_spec,
            compiler_params=pltpu.CompilerParams(
                dimension_semantics=("parallel",),
                vmem_limit_bytes=vmem_limit,
            ),
        )(x, inp, params["wx"], params["wi"], params["bqkv"], params["wo"],
          params["bo"])

    if _SINGLE_BUFFER_CONSTS[0]:
        try:
            outs = _run(True)
        except Exception:
            # This JAX build does not accept Buffered(1) on the top-level
            # pallas_call pipeline; fall back to default double-buffering.
            _SINGLE_BUFFER_CONSTS[0] = False
            outs = _run(False)
    else:
        outs = _run(False)

    if not return_attention:
        return outs[0]
    o, attn = outs
    if attn_flat:
        attn = attn.reshape(B, H, S, S)
    return o, attn


def _xavier_uniform(key, out_features, in_features):
    a = sqrt(6.0 / (in_features + out_features))
    return jax.random.uniform(key, (out_features, in_features),
                              dtype=jnp.float32, minval=-a, maxval=a)


def _reference(x, inp, wqkv_t, bqkv, wo_t, bo, num_heads):
    """Pure-JAX f32 reference mirroring the PyTorch forward (original layout)."""
    B, S, _ = x.shape
    E = wo_t.shape[0]
    hd = E // num_heads
    xcat = jnp.concatenate([x, inp], axis=-1)
    qkv = xcat @ wqkv_t + bqkv.reshape(-1)                       # (B, S, 3E)
    qkv = qkv.reshape(B, S, num_heads, 3 * hd).transpose(0, 2, 1, 3)
    q, k, v = jnp.split(qkv, 3, axis=-1)
    logits = jnp.einsum("bhqd,bhkd->bhqk", q, k) / sqrt(hd)
    attn = jax.nn.softmax(logits, axis=-1)
    vals = jnp.einsum("bhqk,bhkd->bhqd", attn, v)
    vals = vals.transpose(0, 2, 1, 3).reshape(B, S, E)
    o = vals @ wo_t + bo.reshape(-1)
    return o, attn


if __name__ == "__main__":
    # Small shapes consistent with the module's forward.
    B, S = 2, 8
    input_dim, orig_inp_dim = 16, 16
    embed_dim, num_heads = 32, 2

    key = jax.random.PRNGKey(0)
    kx, ki, kw1, kw2 = jax.random.split(key, 4)

    x = jax.random.normal(kx, (B, S, input_dim), dtype=jnp.float32)
    inp = jax.random.normal(ki, (B, S, orig_inp_dim), dtype=jnp.float32)

    # Deterministic parameter init (xavier_uniform weights, zero biases),
    # matching the shapes from __init__ / _reset_parameters.
    wqkv = _xavier_uniform(kw1, 3 * embed_dim, input_dim + orig_inp_dim)
    wo = _xavier_uniform(kw2, embed_dim, embed_dim)
    wqkv_t = wqkv.T                                     # (Dcat, 3E)
    wo_t = wo.T                                         # (E, E)
    bqkv = jnp.zeros((3 * embed_dim,), dtype=jnp.float32)
    bo = jnp.zeros((embed_dim,), dtype=jnp.float32)

    o_ref, attn_ref = _reference(x, inp, wqkv_t, bqkv, wo_t, bo, num_heads)

    # ---- exactness check: f32 MXU operands (only the EUP approx reciprocal
    # in the softmax denominator differs from the pure-f32 reference) --------
    params_f32 = prepare_mha_params(wqkv_t, bqkv, wo_t, bo, num_heads=num_heads,
                                    input_dim=input_dim, mxu_dtype=jnp.float32)
    o32, a32 = multihead_attention_my(x, inp, params_f32)
    o32 = jax.block_until_ready(o32)
    a32 = jax.block_until_ready(a32)
    assert jnp.allclose(o32, o_ref, atol=2e-3, rtol=2e-3)
    assert jnp.allclose(a32, attn_ref, atol=2e-3, rtol=2e-3)

    # ---- default fast path: bf16 MXU operands, f32 accumulation/softmax -----
    params = prepare_mha_params(wqkv_t, bqkv, wo_t, bo, num_heads=num_heads,
                                input_dim=input_dim)     # prepared once, reused
    o_fast, attn_fast = multihead_attention_my(x, inp, params)
    o_fast = jax.block_until_ready(o_fast)
    attn_fast = jax.block_until_ready(attn_fast)
    # Tolerances reflect bf16 matmul operands (accumulation stays f32).
    assert jnp.allclose(o_fast, o_ref, atol=1e-1, rtol=1e-1)
    assert jnp.allclose(attn_fast, attn_ref, atol=5e-2, rtol=5e-2)

    # ---- o-only path (drops the dominant attention-map HBM writeback) -------
    o_only = multihead_attention_my(x, inp, params, return_attention=False)
    o_only = jax.block_until_ready(o_only)
    assert jnp.allclose(o_only, o_fast, atol=1e-5, rtol=1e-5)

    print("KERNEL_OK")
</pallas_src>

<mosaic_0001>
module attributes {stable_mosaic.version = 11 : i64} {
  func.func @_mha_kernel(%arg0: i32, %arg1: memref<1x8x16xf32, #tpu.memory_space<vmem>>, %arg2: memref<1x8x16xf32, #tpu.memory_space<vmem>>, %arg3: memref<16x768xf32, #tpu.memory_space<vmem>>, %arg4: memref<16x768xf32, #tpu.memory_space<vmem>>, %arg5: memref<1x768xf32, #tpu.memory_space<vmem>>, %arg6: memref<256x32xf32, #tpu.memory_space<vmem>>, %arg7: memref<1x32xf32, #tpu.memory_space<vmem>>, %arg8: memref<1x8x32xf32, #tpu.memory_space<vmem>>, %arg9: memref<1x1x128xf32, #tpu.memory_space<vmem>>, %arg10: memref<8x256xf32, #tpu.memory_space<vmem>>) attributes {dimension_semantics = [#tpu.dimension_semantics<parallel>], iteration_bounds = array<i64: 2>, scalar_prefetch = 0 : i64, scratch_operands = 1 : i64, tpu.core_type = #tpu.core_type<tc>, window_params = [{transform_indices = @transform_0, window_bounds = array<i64: 1, 8, 16>}, {transform_indices = @transform_1, window_bounds = array<i64: 1, 8, 16>}, {pipeline_mode = #tpu.pipeline_mode<synchronous>, transform_indices = @transform_2, window_bounds = array<i64: 16, 768>}, {pipeline_mode = #tpu.pipeline_mode<synchronous>, transform_indices = @transform_3, window_bounds = array<i64: 16, 768>}, {pipeline_mode = #tpu.pipeline_mode<synchronous>, transform_indices = @transform_4, window_bounds = array<i64: 1, 768>}, {pipeline_mode = #tpu.pipeline_mode<synchronous>, transform_indices = @transform_5, window_bounds = array<i64: 256, 32>}, {pipeline_mode = #tpu.pipeline_mode<synchronous>, transform_indices = @transform_6, window_bounds = array<i64: 1, 32>}, {transform_indices = @transform_7, window_bounds = array<i64: 1, 8, 32>}, {transform_indices = @transform_8, window_bounds = array<i64: 1, 1, 128>}]} {
    %c0 = arith.constant 0 : index
    %c0_0 = arith.constant 0 : index
    %c0_1 = arith.constant 0 : index
    %0 = vector.load %arg1[%c0, %c0_0, %c0_1] : memref<1x8x16xf32, #tpu.memory_space<vmem>>, vector<1x8x16xf32>
    %1 = vector.shape_cast %0 : vector<1x8x16xf32> to vector<8x16xf32>
    %c0_2 = arith.constant 0 : index
    %c0_3 = arith.constant 0 : index
    %c0_4 = arith.constant 0 : index
    %2 = vector.load %arg2[%c0_2, %c0_3, %c0_4] : memref<1x8x16xf32, #tpu.memory_space<vmem>>, vector<1x8x16xf32>
    %3 = vector.shape_cast %2 : vector<1x8x16xf32> to vector<8x16xf32>
    %c0_5 = arith.constant 0 : index
    %c0_6 = arith.constant 0 : index
    %4 = vector.load %arg3[%c0_5, %c0_6] : memref<16x768xf32, #tpu.memory_space<vmem>>, vector<16x768xf32>
    %cst = arith.constant dense<0.000000e+00> : vector<8x768xf32>
    %5 = tpu.matmul %1, %4, %cst {dimension_numbers = #tpu.dot_dimension_numbers<[1], [0], [0], [1], [0, 0, 1, 1], [], []>} : vector<8x16xf32>, vector<16x768xf32>, vector<8x768xf32> -> vector<8x768xf32>
    %c0_7 = arith.constant 0 : index
    %c0_8 = arith.constant 0 : index
    %6 = vector.load %arg4[%c0_7, %c0_8] : memref<16x768xf32, #tpu.memory_space<vmem>>, vector<16x768xf32>
    %cst_9 = arith.constant dense<0.000000e+00> : vector<8x768xf32>
    %7 = tpu.matmul %3, %6, %cst_9 {dimension_numbers = #tpu.dot_dimension_numbers<[1], [0], [0], [1], [0, 0, 1, 1], [], []>} : vector<8x16xf32>, vector<16x768xf32>, vector<8x768xf32> -> vector<8x768xf32>
    %8 = arith.addf %5, %7 : vector<8x768xf32>
    %c0_10 = arith.constant 0 : index
    %c0_11 = arith.constant 0 : index
    %9 = vector.load %arg5[%c0_10, %c0_11] : memref<1x768xf32, #tpu.memory_space<vmem>>, vector<1x768xf32>
    %10 = vector.broadcast %9 : vector<1x768xf32> to vector<8x768xf32>
    %11 = arith.addf %8, %10 : vector<8x768xf32>
    %12 = vector.extract_strided_slice %11 {offsets = [0, 0], sizes = [8, 128], strides = [1, 1]} : vector<8x768xf32> to vector<8x128xf32>
    %13 = vector.shape_cast %12 : vector<8x128xf32> to vector<1x8x128xf32>
    %14 = vector.extract_strided_slice %11 {offsets = [0, 256], sizes = [8, 128], strides = [1, 1]} : vector<8x768xf32> to vector<8x128xf32>
    %15 = vector.shape_cast %14 : vector<8x128xf32> to vector<1x8x128xf32>
    %16 = vector.extract_strided_slice %11 {offsets = [0, 512], sizes = [8, 128], strides = [1, 1]} : vector<8x768xf32> to vector<8x128xf32>
    %17 = vector.shape_cast %16 : vector<8x128xf32> to vector<1x8x128xf32>
    "tpu.trace_start"() <{level = 10 : i32, message = "bqd,bkd->bqk"}> : () -> ()
    %cst_12 = arith.constant dense<0.000000e+00> : vector<1x8x8xf32>
    %18 = tpu.matmul %13, %15, %cst_12 {dimension_numbers = #tpu.dot_dimension_numbers<[2], [2], [1], [1], [0, 0, 0, 1, 1, 1], [0], [0]>} : vector<1x8x128xf32>, vector<1x8x128xf32>, vector<1x8x8xf32> -> vector<1x8x8xf32>
    "tpu.trace_stop"() : () -> ()
    %cst_13 = arith.constant dense<0xFF800000> : vector<1x8xf32>
    %19 = vector.multi_reduction <maximumf>, %18, %cst_13 [2] : vector<1x8x8xf32> to vector<1x8xf32>
    %20 = vector.shape_cast %19 : vector<1x8xf32> to vector<1x8x1xf32>
    %21 = vector.broadcast %20 : vector<1x8x1xf32> to vector<1x8x8xf32>
    %22 = arith.subf %18, %21 : vector<1x8x8xf32>
    %23 = math.exp %22 : vector<1x8x8xf32>
    %cst_14 = arith.constant dense<0.000000e+00> : vector<1x8xf32>
    %24 = vector.multi_reduction <add>, %23, %cst_14 [2] : vector<1x8x8xf32> to vector<1x8xf32>
    %25 = vector.shape_cast %24 : vector<1x8xf32> to vector<1x8x1xf32>
    %26 = tpu.reciprocal %25 {approx = true} : vector<1x8x1xf32> -> vector<1x8x1xf32>
    %27 = vector.broadcast %26 : vector<1x8x1xf32> to vector<1x8x8xf32>
    %28 = arith.mulf %23, %27 : vector<1x8x8xf32>
    %29 = vector.shape_cast %28 : vector<1x8x8xf32> to vector<1x64xf32>
    %c0_15 = arith.constant 0 : index
    %c0_16 = arith.constant 0 : index
    %c0_17 = arith.constant 0 : index
    %30 = vector.load %arg9[%c0_15, %c0_16, %c0_17] : memref<1x1x128xf32, #tpu.memory_space<vmem>>, vector<1x1x64xf32>
    %31 = vector.shape_cast %30 : vector<1x1x64xf32> to vector<1x64xf32>
    %32 = vector.shape_cast %29 : vector<1x64xf32> to vector<1x1x64xf32>
    tpu.vector_store %arg9[%c0_15, %c0_16, %c0_17], %32 {strides = array<i32>} : memref<1x1x128xf32, #tpu.memory_space<vmem>>, vector<1x1x64xf32>,
    "tpu.trace_start"() <{level = 10 : i32, message = "bqk,bkd->bqd"}> : () -> ()
    %cst_18 = arith.constant dense<0.000000e+00> : vector<1x8x128xf32>
    %33 = tpu.matmul %28, %17, %cst_18 {dimension_numbers = #tpu.dot_dimension_numbers<[2], [1], [1], [2], [0, 0, 0, 1, 1, 2], [0], [0]>} : vector<1x8x8xf32>, vector<1x8x128xf32>, vector<1x8x128xf32> -> vector<1x8x128xf32>
    "tpu.trace_stop"() : () -> ()
    %34 = vector.shape_cast %33 : vector<1x8x128xf32> to vector<8x128xf32>
    %c0_19 = arith.constant 0 : index
    %c0_20 = arith.constant 0 : index
    %35 = vector.load %arg10[%c0_19, %c0_20] : memref<8x256xf32, #tpu.memory_space<vmem>>, vector<8x128xf32>
    tpu.vector_store %arg10[%c0_19, %c0_20], %34 {strides = array<i32>} : memref<8x256xf32, #tpu.memory_space<vmem>>, vector<8x128xf32>,
    %36 = vector.extract_strided_slice %11 {offsets = [0, 128], sizes = [8, 128], strides = [1, 1]} : vector<8x768xf32> to vector<8x128xf32>
    %37 = vector.shape_cast %36 : vector<8x128xf32> to vector<1x8x128xf32>
    %38 = vector.extract_strided_slice %11 {offsets = [0, 384], sizes = [8, 128], strides = [1, 1]} : vector<8x768xf32> to vector<8x128xf32>
    %39 = vector.shape_cast %38 : vector<8x128xf32> to vector<1x8x128xf32>
    %40 = vector.extract_strided_slice %11 {offsets = [0, 640], sizes = [8, 128], strides = [1, 1]} : vector<8x768xf32> to vector<8x128xf32>
    %41 = vector.shape_cast %40 : vector<8x128xf32> to vector<1x8x128xf32>
    "tpu.trace_start"() <{level = 10 : i32, message = "bqd,bkd->bqk"}> : () -> ()
    %cst_21 = arith.constant dense<0.000000e+00> : vector<1x8x8xf32>
    %42 = tpu.matmul %37, %39, %cst_21 {dimension_numbers = #tpu.dot_dimension_numbers<[2], [2], [1], [1], [0, 0, 0, 1, 1, 1], [0], [0]>} : vector<1x8x128xf32>, vector<1x8x128xf32>, vector<1x8x8xf32> -> vector<1x8x8xf32>
    "tpu.trace_stop"() : () -> ()
    %cst_22 = arith.constant dense<0xFF800000> : vector<1x8xf32>
    %43 = vector.multi_reduction <maximumf>, %42, %cst_22 [2] : vector<1x8x8xf32> to vector<1x8xf32>
    %44 = vector.shape_cast %43 : vector<1x8xf32> to vector<1x8x1xf32>
    %45 = vector.broadcast %44 : vector<1x8x1xf32> to vector<1x8x8xf32>
    %46 = arith.subf %42, %45 : vector<1x8x8xf32>
    %47 = math.exp %46 : vector<1x8x8xf32>
    %cst_23 = arith.constant dense<0.000000e+00> : vector<1x8xf32>
    %48 = vector.multi_reduction <add>, %47, %cst_23 [2] : vector<1x8x8xf32> to vector<1x8xf32>
    %49 = vector.shape_cast %48 : vector<1x8xf32> to vector<1x8x1xf32>
    %50 = tpu.reciprocal %49 {approx = true} : vector<1x8x1xf32> -> vector<1x8x1xf32>
    %51 = vector.broadcast %50 : vector<1x8x1xf32> to vector<1x8x8xf32>
    %52 = arith.mulf %47, %51 : vector<1x8x8xf32>
    %53 = vector.shape_cast %52 : vector<1x8x8xf32> to vector<1x64xf32>
    %c0_24 = arith.constant 0 : index
    %c0_25 = arith.constant 0 : index
    %c64 = arith.constant 64 : index
    %54 = vector.load %arg9[%c0_24, %c0_25, %c64] : memref<1x1x128xf32, #tpu.memory_space<vmem>>, vector<1x1x64xf32>
    %55 = vector.shape_cast %54 : vector<1x1x64xf32> to vector<1x64xf32>
    %56 = vector.shape_cast %53 : vector<1x64xf32> to vector<1x1x64xf32>
    tpu.vector_store %arg9[%c0_24, %c0_25, %c64], %56 {strides = array<i32>} : memref<1x1x128xf32, #tpu.memory_space<vmem>>, vector<1x1x64xf32>,
    "tpu.trace_start"() <{level = 10 : i32, message = "bqk,bkd->bqd"}> : () -> ()
    %cst_26 = arith.constant dense<0.000000e+00> : vector<1x8x128xf32>
    %57 = tpu.matmul %52, %41, %cst_26 {dimension_numbers = #tpu.dot_dimension_numbers<[2], [1], [1], [2], [0, 0, 0, 1, 1, 2], [0], [0]>} : vector<1x8x8xf32>, vector<1x8x128xf32>, vector<1x8x128xf32> -> vector<1x8x128xf32>
    "tpu.trace_stop"() : () -> ()
    %58 = vector.shape_cast %57 : vector<1x8x128xf32> to vector<8x128xf32>
    %c0_27 = arith.constant 0 : index
    %c128 = arith.constant 128 : index
    %59 = vector.load %arg10[%c0_27, %c128] : memref<8x256xf32, #tpu.memory_space<vmem>>, vector<8x128xf32>
    tpu.vector_store %arg10[%c0_27, %c128], %58 {strides = array<i32>} : memref<8x256xf32, #tpu.memory_space<vmem>>, vector<8x128xf32>,
    %c0_28 = arith.constant 0 : index
    %c0_29 = arith.constant 0 : index
    %60 = vector.load %arg10[%c0_28, %c0_29] : memref<8x256xf32, #tpu.memory_space<vmem>>, vector<8x256xf32>
    %c0_30 = arith.constant 0 : index
    %c0_31 = arith.constant 0 : index
    %61 = vector.load %arg6[%c0_30, %c0_31] : memref<256x32xf32, #tpu.memory_space<vmem>>, vector<256x32xf32>
    %cst_32 = arith.constant dense<0.000000e+00> : vector<8x32xf32>
    %62 = tpu.matmul %60, %61, %cst_32 {dimension_numbers = #tpu.dot_dimension_numbers<[1], [0], [0], [1], [0, 0, 1, 1], [], []>} : vector<8x256xf32>, vector<256x32xf32>, vector<8x32xf32> -> vector<8x32xf32>
    %c0_33 = arith.constant 0 : index
    %c0_34 = arith.constant 0 : index
    %63 = vector.load %arg7[%c0_33, %c0_34] : memref<1x32xf32, #tpu.memory_space<vmem>>, vector<1x32xf32>
    %64 = vector.broadcast %63 : vector<1x32xf32> to vector<8x32xf32>
    %65 = arith.addf %62, %64 : vector<8x32xf32>
    %66 = vector.shape_cast %65 : vector<8x32xf32> to vector<1x8x32xf32>
    %c0_35 = arith.constant 0 : index
    %c0_36 = arith.constant 0 : index
    %c0_37 = arith.constant 0 : index
    %67 = vector.load %arg8[%c0_35, %c0_36, %c0_37] : memref<1x8x32xf32, #tpu.memory_space<vmem>>, vector<1x8x32xf32>
    tpu.vector_store %arg8[%c0_35, %c0_36, %c0_37], %66 {strides = array<i32>} : memref<1x8x32xf32, #tpu.memory_space<vmem>>, vector<1x8x32xf32>,
    return
  }
  func.func @transform_0(%arg0: i32) -> (i32, i32, i32) {
    %c0_i32 = arith.constant 0 : i32
    %c0_i32_0 = arith.constant 0 : i32
    %c0_i32_1 = arith.constant 0 : i32
    return %arg0, %c0_i32, %c0_i32_0 : i32, i32, i32
  }
  func.func @transform_1(%arg0: i32) -> (i32, i32, i32) {
    %c0_i32 = arith.constant 0 : i32
    %c0_i32_0 = arith.constant 0 : i32
    %c0_i32_1 = arith.constant 0 : i32
    return %arg0, %c0_i32, %c0_i32_0 : i32, i32, i32
  }
  func.func @transform_2(%arg0: i32) -> (i32, i32) {
    %c0_i32 = arith.constant 0 : i32
    %c0_i32_0 = arith.constant 0 : i32
    %c0_i32_1 = arith.constant 0 : i32
    return %c0_i32, %c0_i32_0 : i32, i32
  }
  func.func @transform_3(%arg0: i32) -> (i32, i32) {
    %c0_i32 = arith.constant 0 : i32
    %c0_i32_0 = arith.constant 0 : i32
    %c0_i32_1 = arith.constant 0 : i32
    return %c0_i32, %c0_i32_0 : i32, i32
  }
  func.func @transform_4(%arg0: i32) -> (i32, i32) {
    %c0_i32 = arith.constant 0 : i32
    %c0_i32_0 = arith.constant 0 : i32
    %c0_i32_1 = arith.constant 0 : i32
    return %c0_i32, %c0_i32_0 : i32, i32
  }
  func.func @transform_5(%arg0: i32) -> (i32, i32) {
    %c0_i32 = arith.constant 0 : i32
    %c0_i32_0 = arith.constant 0 : i32
    %c0_i32_1 = arith.constant 0 : i32
    return %c0_i32, %c0_i32_0 : i32, i32
  }
  func.func @transform_6(%arg0: i32) -> (i32, i32) {
    %c0_i32 = arith.constant 0 : i32
    %c0_i32_0 = arith.constant 0 : i32
    %c0_i32_1 = arith.constant 0 : i32
    return %c0_i32, %c0_i32_0 : i32, i32
  }
  func.func @transform_7(%arg0: i32) -> (i32, i32, i32) {
    %c0_i32 = arith.constant 0 : i32
    %c0_i32_0 = arith.constant 0 : i32
    %c0_i32_1 = arith.constant 0 : i32
    return %arg0, %c0_i32, %c0_i32_0 : i32, i32, i32
  }
  func.func @transform_8(%arg0: i32) -> (i32, i32, i32) {
    %c0_i32 = arith.constant 0 : i32
    %c0_i32_0 = arith.constant 0 : i32
    %c0_i32_1 = arith.constant 0 : i32
    return %arg0, %c0_i32, %c0_i32_0 : i32, i32, i32
  }
}

module attributes {stable_mosaic.version = 11 : i64} {
  func.func @_mha_kernel(%arg0: i32, %arg1: memref<1x8x16xf32, #tpu.memory_space<vmem>>, %arg2: memref<1x8x16xf32, #tpu.memory_space<vmem>>, %arg3: memref<16x768xf32, #tpu.memory_space<vmem>>, %arg4: memref<16x768xf32, #tpu.memory_space<vmem>>, %arg5: memref<1x768xf32, #tpu.memory_space<vmem>>, %arg6: memref<256x32xf32, #tpu.memory_space<vmem>>, %arg7: memref<1x32xf32, #tpu.memory_space<vmem>>, %arg8: memref<1x8x32xf32, #tpu.memory_space<vmem>>, %arg9: memref<1x1x128xf32, #tpu.memory_space<vmem>>, %arg10: memref<8x256xf32, #tpu.memory_space<vmem>>) attributes {dimension_semantics = [#tpu.dimension_semantics<parallel>], iteration_bounds = array<i64: 2>, scalar_prefetch = 0 : i64, scratch_operands = 1 : i64, tpu.core_type = #tpu.core_type<tc>, window_params = [{transform_indices = @transform_0, window_bounds = array<i64: 1, 8, 16>}, {transform_indices = @transform_1, window_bounds = array<i64: 1, 8, 16>}, {pipeline_mode = #tpu.pipeline_mode<synchronous>, transform_indices = @transform_2, window_bounds = array<i64: 16, 768>}, {pipeline_mode = #tpu.pipeline_mode<synchronous>, transform_indices = @transform_3, window_bounds = array<i64: 16, 768>}, {pipeline_mode = #tpu.pipeline_mode<synchronous>, transform_indices = @transform_4, window_bounds = array<i64: 1, 768>}, {pipeline_mode = #tpu.pipeline_mode<synchronous>, transform_indices = @transform_5, window_bounds = array<i64: 256, 32>}, {pipeline_mode = #tpu.pipeline_mode<synchronous>, transform_indices = @transform_6, window_bounds = array<i64: 1, 32>}, {transform_indices = @transform_7, window_bounds = array<i64: 1, 8, 32>}, {transform_indices = @transform_8, window_bounds = array<i64: 1, 1, 128>}]} {
    %c0 = arith.constant 0 : index
    %c0_0 = arith.constant 0 : index
    %c0_1 = arith.constant 0 : index
    %0 = vector.load %arg1[%c0, %c0_0, %c0_1] : memref<1x8x16xf32, #tpu.memory_space<vmem>>, vector<1x8x16xf32>
    %1 = vector.shape_cast %0 : vector<1x8x16xf32> to vector<8x16xf32>
    %c0_2 = arith.constant 0 : index
    %c0_3 = arith.constant 0 : index
    %c0_4 = arith.constant 0 : index
    %2 = vector.load %arg2[%c0_2, %c0_3, %c0_4] : memref<1x8x16xf32, #tpu.memory_space<vmem>>, vector<1x8x16xf32>
    %3 = vector.shape_cast %2 : vector<1x8x16xf32> to vector<8x16xf32>
    %c0_5 = arith.constant 0 : index
    %c0_6 = arith.constant 0 : index
    %4 = vector.load %arg3[%c0_5, %c0_6] : memref<16x768xf32, #tpu.memory_space<vmem>>, vector<16x768xf32>
    %cst = arith.constant dense<0.000000e+00> : vector<8x768xf32>
    %5 = tpu.matmul %1, %4, %cst {dimension_numbers = #tpu.dot_dimension_numbers<[1], [0], [0], [1], [0, 0, 1, 1], [], []>} : vector<8x16xf32>, vector<16x768xf32>, vector<8x768xf32> -> vector<8x768xf32>
    %c0_7 = arith.constant 0 : index
    %c0_8 = arith.constant 0 : index
    %6 = vector.load %arg4[%c0_7, %c0_8] : memref<16x768xf32, #tpu.memory_space<vmem>>, vector<16x768xf32>
    %cst_9 = arith.constant dense<0.000000e+00> : vector<8x768xf32>
    %7 = tpu.matmul %3, %6, %cst_9 {dimension_numbers = #tpu.dot_dimension_numbers<[1], [0], [0], [1], [0, 0, 1, 1], [], []>} : vector<8x16xf32>, vector<16x768xf32>, vector<8x768xf32> -> vector<8x768xf32>
    %8 = arith.addf %5, %7 : vector<8x768xf32>
    %c0_10 = arith.constant 0 : index
    %c0_11 = arith.constant 0 : index
    %9 = vector.load %arg5[%c0_10, %c0_11] : memref<1x768xf32, #tpu.memory_space<vmem>>, vector<1x768xf32>
    %10 = vector.broadcast %9 : vector<1x768xf32> to vector<8x768xf32>
    %11 = arith.addf %8, %10 : vector<8x768xf32>
    %12 = vector.extract_strided_slice %11 {offsets = [0, 0], sizes = [8, 128], strides = [1, 1]} : vector<8x768xf32> to vector<8x128xf32>
    %13 = vector.shape_cast %12 : vector<8x128xf32> to vector<1x8x128xf32>
    %14 = vector.extract_strided_slice %11 {offsets = [0, 256], sizes = [8, 128], strides = [1, 1]} : vector<8x768xf32> to vector<8x128xf32>
    %15 = vector.shape_cast %14 : vector<8x128xf32> to vector<1x8x128xf32>
    %16 = vector.extract_strided_slice %11 {offsets = [0, 512], sizes = [8, 128], strides = [1, 1]} : vector<8x768xf32> to vector<8x128xf32>
    %17 = vector.shape_cast %16 : vector<8x128xf32> to vector<1x8x128xf32>
    "tpu.trace_start"() <{level = 10 : i32, message = "bqd,bkd->bqk"}> : () -> ()
    %cst_12 = arith.constant dense<0.000000e+00> : vector<1x8x8xf32>
    %18 = tpu.matmul %13, %15, %cst_12 {dimension_numbers = #tpu.dot_dimension_numbers<[2], [2], [1], [1], [0, 0, 0, 1, 1, 1], [0], [0]>} : vector<1x8x128xf32>, vector<1x8x128xf32>, vector<1x8x8xf32> -> vector<1x8x8xf32>
    "tpu.trace_stop"() : () -> ()
    %cst_13 = arith.constant dense<0xFF800000> : vector<1x8xf32>
    %19 = vector.multi_reduction <maximumf>, %18, %cst_13 [2] : vector<1x8x8xf32> to vector<1x8xf32>
    %20 = vector.shape_cast %19 : vector<1x8xf32> to vector<1x8x1xf32>
    %21 = vector.broadcast %20 : vector<1x8x1xf32> to vector<1x8x8xf32>
    %22 = arith.subf %18, %21 : vector<1x8x8xf32>
    %23 = math.exp %22 : vector<1x8x8xf32>
    %cst_14 = arith.constant dense<0.000000e+00> : vector<1x8xf32>
    %24 = vector.multi_reduction <add>, %23, %cst_14 [2] : vector<1x8x8xf32> to vector<1x8xf32>
    %25 = vector.shape_cast %24 : vector<1x8xf32> to vector<1x8x1xf32>
    %26 = tpu.reciprocal %25 {approx = true} : vector<1x8x1xf32> -> vector<1x8x1xf32>
    %27 = vector.broadcast %26 : vector<1x8x1xf32> to vector<1x8x8xf32>
    %28 = arith.mulf %23, %27 : vector<1x8x8xf32>
    %29 = vector.shape_cast %28 : vector<1x8x8xf32> to vector<1x64xf32>
    %c0_15 = arith.constant 0 : index
    %c0_16 = arith.constant 0 : index
    %c0_17 = arith.constant 0 : index
    %30 = vector.load %arg9[%c0_15, %c0_16, %c0_17] : memref<1x1x128xf32, #tpu.memory_space<vmem>>, vector<1x1x64xf32>
    %31 = vector.shape_cast %30 : vector<1x1x64xf32> to vector<1x64xf32>
    %32 = vector.shape_cast %29 : vector<1x64xf32> to vector<1x1x64xf32>
    tpu.vector_store %arg9[%c0_15, %c0_16, %c0_17], %32 {strides = array<i32>} : memref<1x1x128xf32, #tpu.memory_space<vmem>>, vector<1x1x64xf32>,
    "tpu.trace_start"() <{level = 10 : i32, message = "bqk,bkd->bqd"}> : () -> ()
    %cst_18 = arith.constant dense<0.000000e+00> : vector<1x8x128xf32>
    %33 = tpu.matmul %28, %17, %cst_18 {dimension_numbers = #tpu.dot_dimension_numbers<[2], [1], [1], [2], [0, 0, 0, 1, 1, 2], [0], [0]>} : vector<1x8x8xf32>, vector<1x8x128xf32>, vector<1x8x128xf32> -> vector<1x8x128xf32>
    "tpu.trace_stop"() : () -> ()
    %34 = vector.shape_cast %33 : vector<1x8x128xf32> to vector<8x128xf32>
    %c0_19 = arith.constant 0 : index
    %c0_20 = arith.constant 0 : index
    %35 = vector.load %arg10[%c0_19, %c0_20] : memref<8x256xf32, #tpu.memory_space<vmem>>, vector<8x128xf32>
    tpu.vector_store %arg10[%c0_19, %c0_20], %34 {strides = array<i32>} : memref<8x256xf32, #tpu.memory_space<vmem>>, vector<8x128xf32>,
    %36 = vector.extract_strided_slice %11 {offsets = [0, 128], sizes = [8, 128], strides = [1, 1]} : vector<8x768xf32> to vector<8x128xf32>
    %37 = vector.shape_cast %36 : vector<8x128xf32> to vector<1x8x128xf32>
    %38 = vector.extract_strided_slice %11 {offsets = [0, 384], sizes = [8, 128], strides = [1, 1]} : vector<8x768xf32> to vector<8x128xf32>
    %39 = vector.shape_cast %38 : vector<8x128xf32> to vector<1x8x128xf32>
    %40 = vector.extract_strided_slice %11 {offsets = [0, 640], sizes = [8, 128], strides = [1, 1]} : vector<8x768xf32> to vector<8x128xf32>
    %41 = vector.shape_cast %40 : vector<8x128xf32> to vector<1x8x128xf32>
    "tpu.trace_start"() <{level = 10 : i32, message = "bqd,bkd->bqk"}> : () -> ()
    %cst_21 = arith.constant dense<0.000000e+00> : vector<1x8x8xf32>
    %42 = tpu.matmul %37, %39, %cst_21 {dimension_numbers = #tpu.dot_dimension_numbers<[2], [2], [1], [1], [0, 0, 0, 1, 1, 1], [0], [0]>} : vector<1x8x128xf32>, vector<1x8x128xf32>, vector<1x8x8xf32> -> vector<1x8x8xf32>
    "tpu.trace_stop"() : () -> ()
    %cst_22 = arith.constant dense<0xFF800000> : vector<1x8xf32>
    %43 = vector.multi_reduction <maximumf>, %42, %cst_22 [2] : vector<1x8x8xf32> to vector<1x8xf32>
    %44 = vector.shape_cast %43 : vector<1x8xf32> to vector<1x8x1xf32>
    %45 = vector.broadcast %44 : vector<1x8x1xf32> to vector<1x8x8xf32>
    %46 = arith.subf %42, %45 : vector<1x8x8xf32>
    %47 = math.exp %46 : vector<1x8x8xf32>
    %cst_23 = arith.constant dense<0.000000e+00> : vector<1x8xf32>
    %48 = vector.multi_reduction <add>, %47, %cst_23 [2] : vector<1x8x8xf32> to vector<1x8xf32>
    %49 = vector.shape_cast %48 : vector<1x8xf32> to vector<1x8x1xf32>
    %50 = tpu.reciprocal %49 {approx = true} : vector<1x8x1xf32> -> vector<1x8x1xf32>
    %51 = vector.broadcast %50 : vector<1x8x1xf32> to vector<1x8x8xf32>
    %52 = arith.mulf %47, %51 : vector<1x8x8xf32>
    %53 = vector.shape_cast %52 : vector<1x8x8xf32> to vector<1x64xf32>
    %c0_24 = arith.constant 0 : index
    %c0_25 = arith.constant 0 : index
    %c64 = arith.constant 64 : index
    %54 = vector.load %arg9[%c0_24, %c0_25, %c64] : memref<1x1x128xf32, #tpu.memory_space<vmem>>, vector<1x1x64xf32>
    %55 = vector.shape_cast %54 : vector<1x1x64xf32> to vector<1x64xf32>
    %56 = vector.shape_cast %53 : vector<1x64xf32> to vector<1x1x64xf32>
    tpu.vector_store %arg9[%c0_24, %c0_25, %c64], %56 {strides = array<i32>} : memref<1x1x128xf32, #tpu.memory_space<vmem>>, vector<1x1x64xf32>,
    "tpu.trace_start"() <{level = 10 : i32, message = "bqk,bkd->bqd"}> : () -> ()
    %cst_26 = arith.constant dense<0.000000e+00> : vector<1x8x128xf32>
    %57 = tpu.matmul %52, %41, %cst_26 {dimension_numbers = #tpu.dot_dimension_numbers<[2], [1], [1], [2], [0, 0, 0, 1, 1, 2], [0], [0]>} : vector<1x8x8xf32>, vector<1x8x128xf32>, vector<1x8x128xf32> -> vector<1x8x128xf32>
    "tpu.trace_stop"() : () -> ()
    %58 = vector.shape_cast %57 : vector<1x8x128xf32> to vector<8x128xf32>
    %c0_27 = arith.constant 0 : index
    %c128 = arith.constant 128 : index
    %59 = vector.load %arg10[%c0_27, %c128] : memref<8x256xf32, #tpu.memory_space<vmem>>, vector<8x128xf32>
    tpu.vector_store %arg10[%c0_27, %c128], %58 {strides = array<i32>} : memref<8x256xf32, #tpu.memory_space<vmem>>, vector<8x128xf32>,
    %c0_28 = arith.constant 0 : index
    %c0_29 = arith.constant 0 : index
    %60 = vector.load %arg10[%c0_28, %c0_29] : memref<8x256xf32, #tpu.memory_space<vmem>>, vector<8x256xf32>
    %c0_30 = arith.constant 0 : index
    %c0_31 = arith.constant 0 : index
    %61 = vector.load %arg6[%c0_30, %c0_31] : memref<256x32xf32, #tpu.memory_space<vmem>>, vector<256x32xf32>
    %cst_32 = arith.constant dense<0.000000e+00> : vector<8x32xf32>
    %62 = tpu.matmul %60, %61, %cst_32 {dimension_numbers = #tpu.dot_dimension_numbers<[1], [0], [0], [1], [0, 0, 1, 1], [], []>} : vector<8x256xf32>, vector<256x32xf32>, vector<8x32xf32> -> vector<8x32xf32>
    %c0_33 = arith.constant 0 : index
    %c0_34 = arith.constant 0 : index
    %63 = vector.load %arg7[%c0_33, %c0_34] : memref<1x32xf32, #tpu.memory_space<vmem>>, vector<1x32xf32>
    %64 = vector.broadcast %63 : vector<1x32xf32> to vector<8x32xf32>
    %65 = arith.addf %62, %64 : vector<8x32xf32>
    %66 = vector.shape_cast %65 : vector<8x32xf32> to vector<1x8x32xf32>
    %c0_35 = arith.constant 0 : index
    %c0_36 = arith.constant 0 : index
    %c0_37 = arith.constant 0 : index
    %67 = vector.load %arg8[%c0_35, %c0_36, %c0_37] : memref<1x8x32xf32, #tpu.memory_space<vmem>>, vector<1x8x32xf32>
    tpu.vector_store %arg8[%c0_35, %c0_36, %c0_37], %66 {strides = array<i32>} : memref<1x8x32xf32, #tpu.memory_space<vmem>>, vector<1x8x32xf32>,
    return
  }
  func.func @transform_0(%arg0: i32) -> (i32, i32, i32) {
    %c0_i32 = arith.constant 0 : i32
    %c0_i32_0 = arith.constant 0 : i32
    %c0_i32_1 = arith.constant 0 : i32
    return %arg0, %c0_i32, %c0_i32_0 : i32, i32, i32
  }
  func.func @transform_1(%arg0: i32) -> (i32, i32, i32) {
    %c0_i32 = arith.constant 0 : i32
    %c0_i32_0 = arith.constant 0 : i32
    %c0_i32_1 = arith.constant 0 : i32
    return %arg0, %c0_i32, %c0_i32_0 : i32, i32, i32
  }
  func.func @transform_2(%arg0: i32) -> (i32, i32) {
    %c0_i32 = arith.constant 0 : i32
    %c0_i32_0 = arith.constant 0 : i32
    %c0_i32_1 = arith.constant 0 : i32
    return %c0_i32, %c0_i32_0 : i32, i32
  }
  func.func @transform_3(%arg0: i32) -> (i32, i32) {
    %c0_i32 = arith.constant 0 : i32
    %c0_i32_0 = arith.constant 0 : i32
    %c0_i32_1 = arith.constant 0 : i32
    return %c0_i32, %c0_i32_0 : i32, i32
  }
  func.func @transform_4(%arg0: i32) -> (i32, i32) {
    %c0_i32 = arith.constant 0 : i32
    %c0_i32_0 = arith.constant 0 : i32
    %c0_i32_1 = arith.constant 0 : i32
    return %c0_i32, %c0_i32_0 : i32, i32
  }
  func.func @transform_5(%arg0: i32) -> (i32, i32) {
    %c0_i32 = arith.constant 0 : i32
    %c0_i32_0 = arith.constant 0 : i32
    %c0_i32_1 = arith.constant 0 : i32
    return %c0_i32, %c0_i32_0 : i32, i32
  }
  func.func @transform_6(%arg0: i32) -> (i32, i32) {
    %c0_i32 = arith.constant 0 : i32
    %c0_i32_0 = arith.constant 0 : i32
    %c0_i32_1 = arith.constant 0 : i32
    return %c0_i32, %c0_i32_0 : i32, i32
  }
  func.func @transform_7(%arg0: i32) -> (i32, i32, i32) {
    %c0_i32 = arith.constant 0 : i32
    %c0_i32_0 = arith.constant 0 : i32
    %c0_i32_1 = arith.constant 0 : i32
    return %arg0, %c0_i32, %c0_i32_0 : i32, i32, i32
  }
  func.func @transform_8(%arg0: i32) -> (i32, i32, i32) {
    %c0_i32 = arith.constant 0 : i32
    %c0_i32_0 = arith.constant 0 : i32
    %c0_i32_1 = arith.constant 0 : i32
    return %arg0, %c0_i32, %c0_i32_0 : i32, i32, i32
  }
}

</mosaic_0001>

<bundles_post_ra>
// kernel: tpu_custom_call.1
= control target key start
LH: loop header
LB: loop body
LE: loop exit
PB: predicated region body
PF: predicated region fallthrough
CT: control target
= control target key end

     0   :  { %s1681_s0 = inlined_call_operand.vmem [shape: f32[2,8,16], index: 0, kind: input, shape index: {}]   ;;  %s1682_s1 = inlined_call_operand.vmem [shape: f32[2,8,16], index: 1, kind: input, shape index: {}]   ;;  %s1683_s2 = inlined_call_operand.vmem [shape: f32[16,768], index: 2, kind: input, shape index: {}]   ;;  %s1684_s3 = inlined_call_operand.vmem [shape: f32[16,768], index: 3, kind: input, shape index: {}]   ;;  %s1685_s4 = inlined_call_operand.vmem [shape: f32[1,768], index: 4, kind: input, shape index: {}]   ;;  %s1686_s5 = inlined_call_operand.vmem [shape: f32[256,32], index: 5, kind: input, shape index: {}]   ;;  %s1687_s6 = inlined_call_operand.vmem [shape: f32[1,32], index: 6, kind: input, shape index: {}]   ;;  %s1688_s7 = inlined_call_operand.hbm [shape: f32[2,8,32], index: 7, kind: output, shape index: {0}]   ;;  %s1689_s8 = inlined_call_operand.hbm [shape: f32[2,1,128], index: 8, kind: output, shape index: {1}]  }
   0x1   :  { %1690 = sst [smem:[#allocation9_spill]] %s1681_s0 }
   0x2   :  { %1691 = sst [smem:[#allocation10_spill]] %s1682_s1 }
   0x3   :  { %14 = vsyncpa [#allocation4], 0 }
   0x4   :  { %16 = vsyncpa [#allocation4 + $0x1], 0 }
   0x5   :  { %17 = vsyncpa [#allocation6], 0 }
   0x6   :  { %19 = vsyncpa [#allocation6 + $0x1], 0  ;;  %s1342_s27 = smov 0   ;;  %s1344_s28 = smov 0  }
   0x7   :  { %s1346_s29 = smov 0   ;;  %s1348_s30 = smov 0  }
   0x8 LB: > { %s1363_s9 = sadd.s32 4294967295, %s1285_s30   ;;  %s1103_s10 = sadd.s32 4294967294, %s1285_s30   ;;  %s1285_s30 = sphi %s1348_s30, %s1699_s30   ;;  %s1281_s29 = sphi %s1346_s29, %s1698_s29   ;;  %s1277_s28 = sphi %s1344_s28, %s1697_s28   ;;  %s1273_s27 = sphi %s1342_s27, %s1696_s27  }
   0x9   : > { %s1367_s11 = sadd.s32 1, %s1285_s30   ;;  %s189_s12 = sadd.s32 1, %s1281_s29 }
   0xa   : > { %s186_s13 = ssub.s32 %s1285_s30, %s1367_s11  ;;  %p199_p0 = scmp.ne.s32.totalorder %s1281_s29, %s1277_s28 }
   0xb   : > { %p187_p1 = scmp.eq.s32.totalorder %s186_s13, 0  ;;  %p200_p2 = scmp.eq.s32.totalorder %s1363_s9, 1 }
   0xc   : > { %p205_p3 = scmp.ne.s32.totalorder %s1277_s28, %s1273_s27  ;;  %p206_p4 = scmp.eq.s32.totalorder %s1103_s10, 1 }
   0xd   : > { %s1378_s14 = scalar_select %p187_p1, %s1281_s29, %s189_s12  }
   0xe   : > { %p1380_p5 = por %p200_p2, %p199_p0  ;;  %p1384_p6 = por %p206_p4, %p205_p3 }
   0xf   : > { %p1106_p7 = scmp.ge.s32.totalorder %s1285_s30, 1  ;;  %p279_p8 = scmp.lt.s32.totalorder %s1285_s30, 3 }
  0x11   : > { %p280_p9 = pnand %p1106_p7, %p279_p8 }
  0x12   : > { %p320_p10 = scmp.lt.s32.totalorder (!%p280_p9), %s1363_s9, 1  ;;  %s1694_s1 = sld [smem:[#allocation10_spill]] (!%p280_p9) }
  0x13   : > { %283 = sbr.rel (%p280_p9) target bundleno = 843 (0x34b), region = 48  ;;  %s1695_s0 = sld [smem:[#allocation9_spill]] (!%p280_p9) }
  0x14   : > { %s1289_s24 = smov (!%p280_p9), 8   ;;  %s1290_s25 = smov (!%p280_p9), 32  }
  0x15   : > { %s1291_s12 = smov (!%p280_p9), 24   ;;  %s1292_s13 = smov (!%p280_p9), 16  }
  0x16   : > { %s1295_s17 = smov (!%p280_p9), 56   ;;  %s1622_s18 = sand.u32 (!%p280_p9), 1, %s1277_s28  }
  0x17   : > { %s319_s19 = scalar_lea.vmem (!%p280_p9), [#allocation5], %s1622_s18  ;;  %s999_s21 = scalar_lea.hbm (!%p280_p9), %s1689_s8, %s1363_s9 }
  0x18   : > { %v348_v0 = vld [vmem:[%s1684_s3 + $0x30] sm:$0xff]  ;;  %v349_v1 = vld [vmem:[%s1684_s3 + $0x38] sm:$0xff]  ;;  %v342_v2 = vld [vmem:[%s1684_s3] sm:$0xff]  ;;  %s321_s10 = scalar_select %p320_p10, %s1363_s9, 1  ;;  %vm354_vm0 = vcmask 130048   ;;  %vm641_vm1 = vcmask 64512  }
  0x19   : > { %372 = vmatpush.msra.mxu2 %v348_v0  ;;  %392 = vmatpush.msra.mxu3 %v349_v1  ;;  %v343_v3 = vld [vmem:[%s1684_s3 + $0x8] sm:$0xff]  ;;  %v350_v5 = vld [vmem:[%s1684_s3 + $0x40] sm:$0xff]  ;;  %v345_v6 = vld [vmem:[%s1684_s3 + $0x18] sm:$0xff]  ;;  %vm654_vm2 = vcmask 1047556   ;;  %vm722_vm3 = vcmask 195584   ;;  %vm724_vm4 = vcmask 261120  }
  0x1a   : > { %v351_v4 = vld [vmem:[%s1684_s3 + $0x48] sm:$0xff]  ;;  %v344_v7 = vld [vmem:[%s1684_s3 + $0x10] sm:$0xff]  ;;  %s1108_s23 = sshll.u32 %s321_s10, 3  ;;  %v353_v9 = vld [vmem:[%s1684_s3 + $0x58] sm:$0xff]  ;;  %vm726_vm5 = vcmask 326656   ;;  %vm728_vm6 = vcmask 392192  }
  0x1b   : > { %373 = vmatpush.msra.mxu2 %v342_v2  ;;  %393 = vmatpush.msra.mxu3 %v343_v3  ;;  %v339_v8 = vld [vmem:[%s1683_s2 + $0x48] sm:$0xff]  ;;  %s327_s26 = scalar_lea.vmem %s1694_s1, %s1108_s23  ;;  %v352_v10 = vld [vmem:[%s1684_s3 + $0x50] sm:$0xff]  ;;  %s323_s10 = scalar_lea.vmem %s1695_s0, %s1108_s23  ;;  %v333_v12 = vld [vmem:[%s1683_s2 + $0x18] sm:$0xff]  ;;  %vm730_vm7 = vcmask 457728   ;;  %vm732_vm8 = vcmask 516096   ;;  %vm866_vm9 = vcmask 1040896  }
  0x1c   : > { %555 = vmatpush.msra.mxu1 %v339_v8  ;;  %v329_v11 = vld [vmem:[%s327_s26] sm:$0xff]  ;;  %v347_v14 = vld [vmem:[%s1684_s3 + $0x28] sm:$0xff]  ;;  %v332_v17 = vld [vmem:[%s1683_s2 + $0x10] sm:$0xff]  ;;  %v1287_v8 = vmov 1983009808   ;;  %s1293_s23 = smov 40  }
  0x1d   : > { %432 = vmatpush.msrb.mxu3 %v351_v4  ;;  %412 = vmatpush.msrb.mxu2 %v350_v5  ;;  %v338_v13 = vld [vmem:[%s1683_s2 + $0x40] sm:$0xff]  ;;  %v337_v18 = vld [vmem:[%s1683_s2 + $0x38] sm:$0xff]  ;;  %v336_v19 = vld [vmem:[%s1683_s2 + $0x30] sm:$0xff]  ;;  %s1294_s26 = smov 48   ;;  %s1001_s22 = sshll.u32 %s319_s19, 4  ;;  %s1002_s22 = int_to_ptr.vmem [resolvable:$true] %s1001_s22 }
  0x1e   : > { %1110 = vmatmul.msk.f32.vlgmr.msra.gmra.mxu2 %vm354_vm0, %v329_v11  ;;  %1111 = vmatmul.msk.f32.vlgmr.msra.gmra.mxu3 %vm354_vm0, %v329_v11  ;;  %v328_v15 = vld [vmem:[%s323_s10] sm:$0xff]  ;;  %v331_v20 = vld [vmem:[%s1683_s2 + $0x8] sm:$0xff]  ;;  %v340_v22 = vld [vmem:[%s1683_s2 + $0x50] sm:$0xff] }
  0x1f   : > { %433 = vmatpush.msrb.mxu3 %v345_v6  ;;  %413 = vmatpush.msrb.mxu2 %v344_v7  ;;  %v346_v16 = vld [vmem:[%s1684_s3 + $0x20] sm:$0xff]  ;;  %v341_v23 = vld [vmem:[%s1683_s2 + $0x58] sm:$0xff]  ;;  %v335_v25 = vld [vmem:[%s1683_s2 + $0x28] sm:$0xff] }
  0x20   : > { %556 = vmatpush.msra.mxu1 %v333_v12  ;;  %535 = vmatpush.msra.mxu0 %v338_v13  ;;  %v330_v21 = vld [vmem:[%s1683_s2] sm:$0xff] }
  0x21   : > { %472 = vmatpush.msra.mxu3 %v353_v9  ;;  %452 = vmatpush.msra.mxu2 %v352_v10  ;;  %v334_v24 = vld [vmem:[%s1683_s2 + $0x20] sm:$0xff]  ;;  %v657_v9 = vunpack.c.l.s4 %v1287_v8  ;;  %v1288_v10 = vmov 1934713408   ;;  %v903_v8 = vld [vmem:[%s1686_s5 + $0x48] sm:$0xff] }
  0x22   : > { %1119 = vmatmul.msk.f32.vlgmr.msra.gmra.mxu1 %vm354_vm0, %v328_v15  ;;  %536 = vmatpush.msra.mxu0 %v332_v17  ;;  %v601_v28 = vld [vmem:[%s1685_s4] sm:$0x3f] }
  0x23   : > { %473 = vmatpush.msra.mxu3 %v347_v14  ;;  %453 = vmatpush.msra.mxu2 %v346_v16  ;;  %v606_v31 = vperm.slane %v601_v28, 3  ;;  %v605_v32 = vperm.slane %v601_v28, 2  ;;  %v603_v41 = vperm.slane %v601_v28, 0  ;;  %v604_v42 = vperm.slane %v601_v28, 1 }
  0x24   : > { %1118 = vmatmul.msk.f32.vlgmr.msra.gmra.mxu0 %vm354_vm0, %v328_v15  ;;  %v608_v49 = vperm.slane %v601_v28, 5  ;;  %v607_v50 = vperm.slane %v601_v28, 4  ;;  %v658_v12 = vunpack.c.0.s8 %v657_v9  ;;  %v918_v9 = vld [vmem:[%s1686_s5 + $0xc0] sm:$0xff] }
  0x26   : > { %1112 = vmatmul.msk.f32.vlgmr.msrb.gmra.mxu2 %vm354_vm0, %v329_v11  ;;  %1113 = vmatmul.msk.f32.vlgmr.msrb.gmra.mxu3 %vm354_vm0, %v329_v11 }
  0x27   : > { %515 = vmatpush.msrb.mxu3 %v337_v18  ;;  %495 = vmatpush.msrb.mxu2 %v336_v19 }
  0x29   : > { %516 = vmatpush.msrb.mxu3 %v331_v20  ;;  %496 = vmatpush.msrb.mxu2 %v330_v21 }
  0x2e   : > { %1114 = vmatmul.msk.f32.vlgmr.msra.gmra.mxu2 %vm354_vm0, %v329_v11  ;;  %1115 = vmatmul.msk.f32.vlgmr.msra.gmra.mxu3 %vm354_vm0, %v329_v11  ;;  %v667_v11 = vunpack.c.l.s4 %v1288_v10  ;;  %v902_v10 = vld [vmem:[%s1686_s5 + $0x40] sm:$0xff] }
  0x2f   : > { %575 = vmatpush.msra.mxu2 %v340_v22  ;;  %595 = vmatpush.msra.mxu3 %v341_v23 }
  0x30   : > { %v668_v16 = vunpack.c.0.s8 %v667_v11  ;;  %v917_v11 = vld [vmem:[%s1686_s5 + $0xb8] sm:$0xff] }
  0x31   : > { %576 = vmatpush.msra.mxu2 %v334_v24  ;;  %596 = vmatpush.msra.mxu3 %v335_v25 }
  0x36   : > { %1116 = vmatmul.msk.f32.vlgmr.msrb.gmra.mxu2 %vm354_vm0, %v328_v15  ;;  %1117 = vmatmul.msk.f32.vlgmr.msrb.gmra.mxu3 %vm354_vm0, %v328_v15 }
  0x3e   : > { %1120 = vmatmul.msk.f32.vlgmr.msra.gmra.mxu2 %vm354_vm0, %v328_v15  ;;  %1121 = vmatmul.msk.f32.vlgmr.msra.gmra.mxu3 %vm354_vm0, %v328_v15 }
  0x9f   : > { %v558_v29 = vpop.f32.mrf.mxu1 }
  0xa1   : > { %v375_v26 = vpop.f32.mrf.mxu2  ;;  %v395_v27 = vpop.f32.mrf.mxu3 }
  0xa2   : > { %v538_v30 = vpop.f32.mrf.mxu0 }
  0xa9   : > { %v415_v33 = vpop.f32.mrf.mxu2  ;;  %v435_v34 = vpop.f32.mrf.mxu3 }
  0xaa   : > { %v559_v35 = vadd.f32 %v558_v29, %v435_v34  ;;  %v539_v36 = vadd.f32 %v538_v30, %v415_v33 }
  0xac   : > { %v618_v37 = vadd.f32 %v606_v31, %v559_v35  ;;  %v617_v38 = vadd.f32 %v605_v32, %v539_v36 }
  0xae   : > { %773 = vmatpush.xpose.msrb.mxu2 %v618_v37  ;;  %636 = vmatpush.xpose.msrb.mxu0 %v617_v38 }
  0xb1   : > { %v455_v39 = vpop.f32.mrf.mxu2  ;;  %v475_v40 = vpop.f32.mrf.mxu3 }
  0xb9   : > { %v498_v43 = vpop.f32.mrf.mxu2  ;;  %v518_v44 = vpop.f32.mrf.mxu3 }
  0xba   : > { %v499_v45 = vadd.f32 %v498_v43, %v375_v26  ;;  %v519_v46 = vadd.f32 %v518_v44, %v395_v27 }
  0xbc   : > { %v615_v47 = vadd.f32 %v603_v41, %v499_v45  ;;  %v616_v48 = vadd.f32 %v604_v42, %v519_v46 }
  0xbe   : > { %637 = vmatmul.f32.vlgmr.msrb.gmra.mxu0 %v615_v47  ;;  %774 = vmatmul.f32.vlgmr.msrb.gmra.mxu2 %v616_v48 }
  0xc1   : > { %v578_v51 = vpop.f32.mrf.mxu2  ;;  %v598_v52 = vpop.f32.mrf.mxu3 }
  0xc2   : > { %v579_v53 = vadd.f32 %v578_v51, %v455_v39  ;;  %v599_v54 = vadd.f32 %v598_v52, %v475_v40 }
  0xc4   : > { %v620_v55 = vadd.f32 %v608_v49, %v599_v54  ;;  %v619_v56 = vadd.f32 %v607_v50, %v579_v53 }
  0xc6   : > { %752 = vmatpush.msrb.mxu1 %v619_v56  ;;  %886 = vmatpush.msrb.mxu3 %v620_v55 }
 0x13b   : > { %v638_v59 = vpop.f32.mrf.mxu0 }
 0x13c   : > { %v642_v60 = vsel %vm641_vm1, %v638_v59, -inf }
 0x141   : > { %v775_v57 = vpop.f32.mrf.mxu2 }
 0x142   : > { %v778_v58 = vsel %vm641_vm1, %v775_v57, -inf }
 0x143   : > { %779 = vmax.xlane.f32.xlu0 %v778_v58 }
 0x14b   : > { %643 = vmax.xlane.f32.xlu0 %v642_v60  ;;  %v909_v60 = vld [vmem:[%s1686_s5 + $0x78] sm:$0xff] }
 0x14c   : > { %930 = vmatpush.msra.mxu0 %v909_v60 }
 0x1b6   : > { %v780_v61 = vpop.xlane.xlu0 %779 }
 0x1b7   : > { %v781_v62 = vsub.f32 %v775_v57, %v780_v61  ;;  %v924_v61 = vld [vmem:[%s1686_s5 + $0xf0] sm:$0xff] }
 0x1b9   : > { %v782_v63 = vmul.f32 1.442695, %v781_v62  ;;  %v908_v62 = vld [vmem:[%s1686_s5 + $0x70] sm:$0xff] }
 0x1ba   : > { %931 = vmatpush.msra.mxu0 %v908_v62 }
 0x1bb   : > { %1183 = vpow2.f32 %v782_v63  ;;  %v923_v63 = vld [vmem:[%s1686_s5 + $0xe8] sm:$0xff] }
 0x1be   : > { %v644_v0 = vpop.xlane.xlu0 %643 }
 0x1bf   : > { %v645_v1 = vsub.f32 %v638_v59, %v644_v0  ;;  %v925_v59 = vld [vmem:[%s1686_s5 + $0xf8] sm:$0xff]  ;;  %v907_v0 = vld [vmem:[%s1686_s5 + $0x68] sm:$0xff] }
 0x1c0   : > { %950 = vmatpush.msra.mxu1 %v925_v59  ;;  %932 = vmatpush.msra.mxu0 %v907_v0 }
 0x1c1   : > { %v1184_v2 = vpop.eup %1183  ;;  %v646_v3 = vmul.f32 1.442695, %v645_v1  ;;  %v922_v1 = vld [vmem:[%s1686_s5 + $0xe0] sm:$0xff] }
 0x1c2   : > { %v784_v4 = vsel %vm641_vm1, %v1184_v2, 0.0  ;;  %951 = vmatpush.msra.mxu1 %v924_v61 }
 0x1c3   : > { %1185 = vpow2.f32 %v646_v3  ;;  %785 = vadd.xlane.f32.xlu1 %v784_v4  ;;  %v921_v3 = vld [vmem:[%s1686_s5 + $0xd8] sm:$0xff] }
 0x1c4   : > { %952 = vmatpush.msra.mxu1 %v923_v63  ;;  %v905_v4 = vld [vmem:[%s1686_s5 + $0x58] sm:$0xff] }
 0x1c6   : > { %953 = vmatpush.msra.mxu1 %v922_v1 }
 0x1c8   : > { %954 = vmatpush.msra.mxu1 %v921_v3 }
 0x1c9   : > { %v1186_v5 = vpop.eup %1185 }
 0x1ca   : > { %v648_v6 = vsel %vm641_vm1, %v1186_v5, 0.0 }
 0x1cb   : > { %649 = vadd.xlane.f32.xlu1 %v648_v6  ;;  %v904_v6 = vld [vmem:[%s1686_s5 + $0x50] sm:$0xff] }
 0x236   : > { %v786_v7 = vpop.xlane.xlu1 %785 }
 0x237   : > { %1187 = vrcp.f32 %v786_v7  ;;  %v919_v7 = vld [vmem:[%s1686_s5 + $0xc8] sm:$0xff] }
 0x23d   : > { %v1188_v13 = vpop.eup %1187 }
 0x23e   : > { %v788_v14 = vmul.f32 %v1188_v13, %v1184_v2  ;;  %v650_v15 = vpop.xlane.xlu1 %649  ;;  %v906_v2 = vld [vmem:[%s1686_s5 + $0x60] sm:$0xff]  ;;  %v916_v13 = vld [vmem:[%s1686_s5 + $0xb0] sm:$0xff] }
 0x23f   : > { %1189 = vrcp.f32 %v650_v15  ;;  %933 = vmatpush.msra.mxu0 %v906_v2  ;;  %v915_v15 = vld [vmem:[%s1686_s5 + $0xa8] sm:$0xff] }
 0x240   : > { %1123 = vmatmul.msk.f32.vlgmr.msrb.gmra.mxu3 %vm641_vm1, %v788_v14  ;;  %v794_v17 = vperm.slane %v788_v14, %v658_v12  ;;  %v789_v18 = vrot.slane %v788_v14, 4  ;;  %v900_v14 = vld [vmem:[%s1686_s5 + $0x30] sm:$0xff] }
 0x241   : > { %934 = vmatpush.msra.mxu0 %v905_v4 }
 0x242   : > { %v1490_v19 = vperm.slane %v794_v17, %v668_v16  ;;  %v799_v20 = vrot.slane %v794_v17, 4  ;;  %v790_v21 = vsel %vm654_vm2, 0.0, %v789_v18  ;;  %v914_v17 = vld [vmem:[%s1686_s5 + $0xa0] sm:$0xff] }
 0x243   : > { %v798_v22 = vperm.slane %v790_v21, %v658_v12  ;;  %935 = vmatpush.msra.mxu0 %v904_v6  ;;  %v898_v18 = vld [vmem:[%s1686_s5 + $0x20] sm:$0xff]  ;;  %v897_v21 = vld [vmem:[%s1686_s5 + $0x18] sm:$0xff] }
 0x244   : > { %v819_v23 = vrot.slane %v1490_v19, 4  ;;  %v800_v24 = vsel %vm654_vm2, 0.0, %v799_v20  ;;  %v913_v20 = vld [vmem:[%s1686_s5 + $0x98] sm:$0xff] }
 0x245   : > { %v1190_v25 = vpop.eup %1189  ;;  %v814_v26 = vperm.slane %v798_v22, %v668_v16  ;;  %v808_v27 = vperm.slane %v800_v24, %v668_v16  ;;  %v809_v48 = vrot.slane %v798_v22, 4  ;;  %936 = vmatpush.msra.mxu0 %v903_v8  ;;  %v912_v22 = vld [vmem:[%s1686_s5 + $0x90] sm:$0xff]  ;;  %v911_v24 = vld [vmem:[%s1686_s5 + $0x88] sm:$0xff] }
 0x246   : > { %v820_v28 = vsel %vm654_vm2, 0.0, %v819_v23  ;;  %v652_v29 = vmul.f32 %v1190_v25, %v1186_v5  ;;  %v920_v5 = vld [vmem:[%s1686_s5 + $0xd0] sm:$0xff] }
 0x247   : > { %828 = vrot.lane.b32.xlu2 %v820_v28, %s1289_s24  ;;  %840 = vrot.lane.b32.xlu1 %v814_v26, %s1290_s25  ;;  %v821_v30 = vrot.slane %v808_v27, 4  ;;  %v823_v45 = vrot.slane %v814_v26, 4  ;;  %v810_v51 = vsel %vm654_vm2, 0.0, %v809_v48  ;;  %v896_v23 = vld [vmem:[%s1686_s5 + $0x10] sm:$0xff]  ;;  %v895_v26 = vld [vmem:[%s1686_s5 + $0x8] sm:$0xff] }
 0x248   : > { %1122 = vmatmul.msk.f32.vlgmr.msrb.gmra.mxu1 %vm641_vm1, %v652_v29  ;;  %v659_v31 = vperm.slane %v652_v29, %v658_v12  ;;  %v653_v32 = vrot.slane %v652_v29, 4  ;;  %v818_v52 = vperm.slane %v810_v51, %v668_v16  ;;  %937 = vmatpush.msra.mxu0 %v902_v10  ;;  %v894_v28 = vld [vmem:[%s1686_s5] sm:$0xff] }
 0x249   : > { %v822_v33 = vsel %vm654_vm2, 0.0, %v821_v30  ;;  %v824_v47 = vsel %vm654_vm2, 0.0, %v823_v45  ;;  %955 = vmatpush.msra.mxu1 %v920_v5 }
 0x24a   : > { %836 = vrot.lane.b32.xlu0 %v822_v33, %s1291_s12  ;;  %v1499_v34 = vperm.slane %v659_v31, %v668_v16  ;;  %v664_v35 = vrot.slane %v659_v31, 4  ;;  %v655_v36 = vsel %vm654_vm2, 0.0, %v653_v32  ;;  %v825_v55 = vrot.slane %v818_v52, 4 }
 0x24b   : > { %v663_v40 = vperm.slane %v655_v36, %v658_v12  ;;  %956 = vmatpush.msra.mxu1 %v919_v7  ;;  %v901_v12 = vld [vmem:[%s1686_s5 + $0x38] sm:$0xff] }
 0x24c   : > { %v665_v37 = vsel %vm654_vm2, 0.0, %v664_v35  ;;  %v684_v38 = vrot.slane %v1499_v34, 4  ;;  %v826_v56 = vsel %vm654_vm2, 0.0, %v825_v55  ;;  %938 = vmatpush.msra.mxu0 %v901_v12 }
 0x24d   : > { %v673_v39 = vperm.slane %v665_v37, %v668_v16  ;;  %v674_v44 = vrot.slane %v663_v40, 4  ;;  %v679_v49 = vperm.slane %v663_v40, %v668_v16  ;;  %957 = vmatpush.msra.mxu1 %v918_v9 }
 0x24e   : > { %v685_v42 = vsel %vm654_vm2, 0.0, %v684_v38  ;;  %939 = vmatpush.msra.mxu0 %v900_v14 }
 0x24f   : > { %832 = vrot.lane.b32.xlu2 %v808_v27, %s1292_s13  ;;  %v686_v41 = vrot.slane %v673_v39, 4  ;;  %v675_v46 = vsel %vm654_vm2, 0.0, %v674_v44  ;;  %v688_v57 = vrot.slane %v679_v49, 4  ;;  %958 = vmatpush.msra.mxu1 %v917_v11  ;;  %v910_v27 = vld [vmem:[%s1686_s5 + $0x80] sm:$0xff] }
 0x250   : > { %v683_v50 = vperm.slane %v675_v46, %v668_v16  ;;  %v899_v16 = vld [vmem:[%s1686_s5 + $0x28] sm:$0xff] }
 0x251   : > { %v687_v43 = vsel %vm654_vm2, 0.0, %v686_v41  ;;  %v689_v58 = vsel %vm654_vm2, 0.0, %v688_v57  ;;  %959 = vmatpush.msra.mxu1 %v916_v13  ;;  %940 = vmatpush.msra.mxu0 %v899_v16 }
 0x252   : > { %693 = vrot.lane.b32.xlu0 %v685_v42, %s1289_s24  ;;  %701 = vrot.lane.b32.xlu1 %v687_v43, %s1291_s12  ;;  %v690_v53 = vrot.slane %v683_v50, 4  ;;  %s1003_s24 = sshll.u32 %s999_s21, 4  ;;  %s1004_s24 = int_to_ptr.hbm [resolvable:$true] %s1003_s24 }
 0x253   : > { %960 = vmatpush.msra.mxu1 %v915_v15  ;;  %941 = vmatpush.msra.mxu0 %v898_v18  ;;  %s1205_s12 = sshra.s32 %s1004_s24, 4  ;;  %s1206_s12 = int_to_ptr.hbm [resolvable:$true] %s1205_s12 }
 0x254   : > { %v691_v54 = vsel %vm654_vm2, 0.0, %v690_v53  ;;  %p1212_p0 = scmp.lt.s32.totalorder %s1206_s12, %s1689_s8 }
 0x255   : > { %961 = vmatpush.msra.mxu1 %v914_v17  ;;  %942 = vmatpush.msra.mxu0 %v897_v21 }
 0x257   : > { %844 = vrot.lane.b32.xlu2 %v824_v47, %s1293_s23  ;;  %962 = vmatpush.msra.mxu1 %v913_v20 }
 0x258   : > { %943 = vmatpush.msra.mxu0 %v896_v23 }
 0x259   : > { %963 = vmatpush.msra.mxu1 %v912_v22 }
 0x25a   : > { %705 = vrot.lane.b32.xlu0 %v679_v49, %s1290_s25  ;;  %713 = vrot.lane.b32.xlu1 %v683_v50, %s1294_s26  ;;  %s977_s25 = scalar_lea.sflag [#allocation6], %s1622_s18 }
 0x25b   : > { %964 = vmatpush.msra.mxu1 %v911_v24  ;;  %944 = vmatpush.msra.mxu0 %v895_v26 }
 0x25d   : > { %965 = vmatpush.msra.mxu1 %v910_v27  ;;  %945 = vmatpush.msra.mxu0 %v894_v28 }
 0x25f   : > { %848 = vrot.lane.b32.xlu2 %v818_v52, %s1294_s26 }
 0x262   : > { %717 = vrot.lane.b32.xlu0 %v691_v54, %s1295_s17 }
 0x267   : > { %852 = vrot.lane.b32.xlu2 %v826_v56, %s1295_s17  ;;  %s1296_s17 = smov 64  }
 0x26f   : > { %697 = vrot.lane.b32.xlu2 %v673_v39, %s1292_s13  ;;  %s1207_s13 = scalar_lea.hbm %s1206_s12, 1 }
 0x270   : > { %p1208_p11 = scmp.ne.s32.totalorder %s1206_s12, %s1207_s13 }
 0x272   : > { %p1209_p12 = pnand %p1208_p11, %p1380_p5 }
 0x274   : > { %p1210_p13 = pneg %p1209_p12 }
 0x277   : > { %709 = vrot.lane.b32.xlu2 %v689_v58, %s1293_s23 }
 0x2a1   : > { %v829_v25 = vpop.permute.xlu2 %828 }
 0x2a2   : > { %v855_v32 = vsel %vm641_vm1, %v1490_v19, %v829_v25 }
 0x2a9   : > { %v833_v29 = vpop.permute.xlu2 %832 }
 0x2aa   : > { %v856_v33 = vsel %vm354_vm0, %v855_v32, %v833_v29 }
 0x2b1   : > { %v845_v30 = vpop.permute.xlu2 %844 }
 0x2b9   : > { %v849_v31 = vpop.permute.xlu2 %848  ;;  %v841_v36 = vpop.permute.xlu1 %840 }
 0x2bc   : > { %v837_v35 = vpop.permute.xlu0 %836 }
 0x2bd   : > { %v857_v37 = vsel %vm722_vm3, %v856_v33, %v837_v35 }
 0x2be   : > { %v858_v38 = vsel %vm724_vm4, %v857_v37, %v841_v36 }
 0x2bf   : > { %v859_v39 = vsel %vm726_vm5, %v858_v38, %v845_v30 }
 0x2c0   : > { %v860_v40 = vsel %vm728_vm6, %v859_v39, %v849_v31 }
 0x2c1   : > { %v853_v41 = vpop.permute.xlu2 %852 }
 0x2c2   : > { %v861_v19 = vsel %vm730_vm7, %v860_v40, %v853_v41 }
 0x2c3   : > { %v888_v42 = vpop.f32.mrf.mxu3  ;;  %863 = vrot.lane.b32.xlu2 %v861_v19, %s1296_s17  ;;  %s1211_s17 = scalar_lea.hbm %s1689_s8, 2 }
 0x2c4   : > { %966 = vmatmul.f32.vlgmr.msra.gmra.mxu1 %v888_v42  ;;  %v694_v43 = vpop.permute.xlu0 %693  ;;  %v702_v45 = vpop.permute.xlu1 %701  ;;  %p1213_p1 = scmp.lt.s32.totalorder %s1211_s17, %s1207_s13 }
 0x2c5   : > { %v754_v44 = vpop.f32.mrf.mxu1  ;;  %v720_v47 = vsel %vm641_vm1, %v1499_v34, %v694_v43 }
 0x2c6   : > { %946 = vmatmul.f32.vlgmr.msra.gmra.mxu0 %v754_v44  ;;  %p1214_p2 = por %p1213_p1, %p1212_p0 }
 0x2c8   : > { %p1215_p3 = pnand %p1214_p2, %p1210_p13 }
 0x2c9   : > { %v698_v46 = vpop.permute.xlu2 %697 }
 0x2ca   : > { %v721_v48 = vsel %vm354_vm0, %v720_v47, %v698_v46 }
 0x2cb   : > { %v723_v50 = vsel %vm722_vm3, %v721_v48, %v702_v45 }
 0x2cc   : > { %v706_v49 = vpop.permute.xlu0 %705  ;;  %v714_v53 = vpop.permute.xlu1 %713 }
 0x2cd   : > { %v725_v51 = vsel %vm724_vm4, %v723_v50, %v706_v49 }
 0x2d1   : > { %v710_v52 = vpop.permute.xlu2 %709 }
 0x2d2   : > { %v727_v54 = vsel %vm726_vm5, %v725_v51, %v710_v52 }
 0x2d3   : > { %v729_v55 = vsel %vm728_vm6, %v727_v54, %v714_v53 }
 0x2d4   : > { %v718_v56 = vpop.permute.xlu0 %717 }
 0x2d5   : > { %v731_v34 = vsel %vm730_vm7, %v729_v55, %v718_v56 }
 0x2d6   : > { %733 = vst.msk [vmem:[%s319_s19] sm:$0x1] %vm732_vm8, %v731_v34 }
 0x31d   : > { %v864_v57 = vpop.permute.xlu2 %863 }
 0x31e   : > { %867 = vst.msk [vmem:[%s319_s19] sm:$0x1] %vm866_vm9, %v864_v57 }
 0x31f   : > { %1218 = shalt.err (!%p1215_p3)
}
 0x320   : > { %1129 = dma.vmem_to_hbm [thread:$0]  (%p1380_p5), %s1002_s22, 16, %s1004_s24, %s977_s25   ;;  %v1182_v58 = vld [vmem:[%s1687_s6] ss:$0 sm:$0xff] }
 0x321   : > { %s1107_s19 = sshll.u32 %s1622_s18, 3  ;;  %s1125_s21 = sshll.u32 %s1363_s9, 3 }
 0x322   : > { %s986_s12 = scalar_lea.hbm %s1688_s7, %s1125_s21  ;;  %s313_s13 = scalar_lea.vmem [#allocation3], %s1107_s19 }
 0x323   : > { %s988_s17 = sshll.u32 %s313_s13, 4  ;;  %s990_s20 = sshll.u32 %s986_s12, 4  ;;  %s989_s17 = int_to_ptr.vmem [resolvable:$true] %s988_s17  ;;  %s991_s20 = int_to_ptr.hbm [resolvable:$true] %s990_s20 }
 0x324   : > { %s972_s9 = scalar_lea.sflag [#allocation4], %s1622_s18  ;;  %s1233_s22 = sshra.s32 %s991_s20, 4  ;;  %s1234_s22 = int_to_ptr.hbm [resolvable:$true] %s1233_s22 }
 0x325   : > { %s1235_s0 = scalar_lea.hbm %s1234_s22, 8  ;;  %s1239_s25 = scalar_lea.hbm %s1688_s7, 16 }
 0x326   : > { %p1236_p4 = scmp.ne.s32.totalorder %s1234_s22, %s1235_s0  ;;  %p1240_p9 = scmp.lt.s32.totalorder %s1234_s22, %s1688_s7 }
 0x327   : > { %p1241_p10 = scmp.lt.s32.totalorder %s1239_s25, %s1235_s0 }
 0x328   : > { %p1237_p7 = pnand %p1236_p4, %p1380_p5 }
 0x329   : > { %p1242_p11 = por %p1241_p10, %p1240_p9 }
 0x32a   : > { %p1238_p8 = pneg %p1237_p7 }
 0x32c   : > { %p1243_p12 = pnand %p1242_p11, %p1238_p8 }
 0x341   : > { %v967_v61 = vpop.f32.mrf.mxu1 }
 0x343   : > { %v947_v59 = vpop.f32.mrf.mxu0 }
 0x344   : > { %v948_v60 = vadd.f32 %v1182_v58, %v947_v59 }
 0x346   : > { %v968_v62 = vadd.f32 %v967_v61, %v948_v60 }
 0x348   : > { %970 = vst.msk [vmem:[%s313_s13] sm:$0xff] %vm724_vm4, %v968_v62 }
 0x349   : > { %1246 = shalt.err (!%p1243_p12)
}
 0x34a   : > { %1128 = dma.vmem_to_hbm [thread:$0]  (%p1380_p5), %s989_s17, 128, %s991_s20, %s972_s9  }
 0x34b PF: > { %p1139_p13 = scmp.ge.s32.totalorder %s1285_s30, 2  ;;  %s1015_s18 = sand.u32 1, %s1273_s27  }
 0x34c   : > { %s1016_s21 = scalar_lea.sflag [#allocation4], %s1015_s18 }
 0x34d   : > { %p1133_p0 = pnand %p1139_p13, %p1384_p6 }
 0x34f   : > { %p1134_p1 = pneg %p1133_p0 }
 0x351   : > { %1264 = dma.done.wait (%p1134_p1), %s1016_s21, 128  }
 0x352   : > { %1266 = vsyncadd (%p1134_p1), %s1016_s21, 4294967168  ;;  %s1026_s23 = scalar_lea.sflag [#allocation6], %s1015_s18 }
 0x353   : > { %1268 = dma.done.wait (%p1134_p1), %s1026_s23, 16  }
 0x354   : > { %1270 = vsyncadd (%p1134_p1), %s1026_s23, 4294967280  ;;  %p22_p5 = scmp.ge.s32.totalorder %s1367_s11, 4   ;;  %s1696_s27 = smov %s1277_s28 }
 0x355   : > { %s1697_s28 = smov %s1281_s29  ;;  %s1698_s29 = smov %s1378_s14 }
 0x356   : > { %s1699_s30 = smov %s1367_s11  ;;  %24 = sbr.rel (!%p22_p5) target bundleno = 8 (0x8), region = 103 }
 0x35b   :  { %1031 = vsyncpa [#allocation4], 1 }
 0x35c   :  { %1033 = vsyncpa [#allocation4 + $0x1], 1 }
 0x35d   :  { %1034 = vsyncpa [#allocation6], 1 }
 0x35e   :  { %1036 = vsyncpa [#allocation6 + $0x1], 1 }

// kernel: tpu_custom_call.1
= control target key start
LH: loop header
LB: loop body
LE: loop exit
PB: predicated region body
PF: predicated region fallthrough
CT: control target
= control target key end

     0   :  { %s1681_s0 = inlined_call_operand.vmem [shape: f32[2,8,16], index: 0, kind: input, shape index: {}]   ;;  %s1682_s1 = inlined_call_operand.vmem [shape: f32[2,8,16], index: 1, kind: input, shape index: {}]   ;;  %s1683_s2 = inlined_call_operand.vmem [shape: f32[16,768], index: 2, kind: input, shape index: {}]   ;;  %s1684_s3 = inlined_call_operand.vmem [shape: f32[16,768], index: 3, kind: input, shape index: {}]   ;;  %s1685_s4 = inlined_call_operand.vmem [shape: f32[1,768], index: 4, kind: input, shape index: {}]   ;;  %s1686_s5 = inlined_call_operand.vmem [shape: f32[256,32], index: 5, kind: input, shape index: {}]   ;;  %s1687_s6 = inlined_call_operand.vmem [shape: f32[1,32], index: 6, kind: input, shape index: {}]   ;;  %s1688_s7 = inlined_call_operand.hbm [shape: f32[2,8,32], index: 7, kind: output, shape index: {0}]   ;;  %s1689_s8 = inlined_call_operand.hbm [shape: f32[2,1,128], index: 8, kind: output, shape index: {1}]  }
   0x1   :  { %1690 = sst [smem:[#allocation9_spill]] %s1681_s0 }
   0x2   :  { %1691 = sst [smem:[#allocation10_spill]] %s1682_s1 }
   0x3   :  { %14 = vsyncpa [#allocation4], 0 }
   0x4   :  { %16 = vsyncpa [#allocation4 + $0x1], 0 }
   0x5   :  { %17 = vsyncpa [#allocation6], 0 }
   0x6   :  { %19 = vsyncpa [#allocation6 + $0x1], 0  ;;  %s1342_s27 = smov 0   ;;  %s1344_s28 = smov 0  }
   0x7   :  { %s1346_s29 = smov 0   ;;  %s1348_s30 = smov 0  }
   0x8 LB: > { %s1363_s9 = sadd.s32 4294967295, %s1285_s30   ;;  %s1103_s10 = sadd.s32 4294967294, %s1285_s30   ;;  %s1285_s30 = sphi %s1348_s30, %s1699_s30   ;;  %s1281_s29 = sphi %s1346_s29, %s1698_s29   ;;  %s1277_s28 = sphi %s1344_s28, %s1697_s28   ;;  %s1273_s27 = sphi %s1342_s27, %s1696_s27  }
   0x9   : > { %s1367_s11 = sadd.s32 1, %s1285_s30   ;;  %s189_s12 = sadd.s32 1, %s1281_s29 }
   0xa   : > { %s186_s13 = ssub.s32 %s1285_s30, %s1367_s11  ;;  %p199_p0 = scmp.ne.s32.totalorder %s1281_s29, %s1277_s28 }
   0xb   : > { %p187_p1 = scmp.eq.s32.totalorder %s186_s13, 0  ;;  %p200_p2 = scmp.eq.s32.totalorder %s1363_s9, 1 }
   0xc   : > { %p205_p3 = scmp.ne.s32.totalorder %s1277_s28, %s1273_s27  ;;  %p206_p4 = scmp.eq.s32.totalorder %s1103_s10, 1 }
   0xd   : > { %s1378_s14 = scalar_select %p187_p1, %s1281_s29, %s189_s12  }
   0xe   : > { %p1380_p5 = por %p200_p2, %p199_p0  ;;  %p1384_p6 = por %p206_p4, %p205_p3 }
   0xf   : > { %p1106_p7 = scmp.ge.s32.totalorder %s1285_s30, 1  ;;  %p279_p8 = scmp.lt.s32.totalorder %s1285_s30, 3 }
  0x11   : > { %p280_p9 = pnand %p1106_p7, %p279_p8 }
  0x12   : > { %p320_p10 = scmp.lt.s32.totalorder (!%p280_p9), %s1363_s9, 1  ;;  %s1694_s1 = sld [smem:[#allocation10_spill]] (!%p280_p9) }
  0x13   : > { %283 = sbr.rel (%p280_p9) target bundleno = 843 (0x34b), region = 48  ;;  %s1695_s0 = sld [smem:[#allocation9_spill]] (!%p280_p9) }
  0x14   : > { %s1289_s24 = smov (!%p280_p9), 8   ;;  %s1290_s25 = smov (!%p280_p9), 32  }
  0x15   : > { %s1291_s12 = smov (!%p280_p9), 24   ;;  %s1292_s13 = smov (!%p280_p9), 16  }
  0x16   : > { %s1295_s17 = smov (!%p280_p9), 56   ;;  %s1622_s18 = sand.u32 (!%p280_p9), 1, %s1277_s28  }
  0x17   : > { %s319_s19 = scalar_lea.vmem (!%p280_p9), [#allocation5], %s1622_s18  ;;  %s999_s21 = scalar_lea.hbm (!%p280_p9), %s1689_s8, %s1363_s9 }
  0x18   : > { %v348_v0 = vld [vmem:[%s1684_s3 + $0x30] sm:$0xff]  ;;  %v349_v1 = vld [vmem:[%s1684_s3 + $0x38] sm:$0xff]  ;;  %v342_v2 = vld [vmem:[%s1684_s3] sm:$0xff]  ;;  %s321_s10 = scalar_select %p320_p10, %s1363_s9, 1  ;;  %vm354_vm0 = vcmask 130048   ;;  %vm641_vm1 = vcmask 64512  }
  0x19   : > { %372 = vmatpush.msra.mxu2 %v348_v0  ;;  %392 = vmatpush.msra.mxu3 %v349_v1  ;;  %v343_v3 = vld [vmem:[%s1684_s3 + $0x8] sm:$0xff]  ;;  %v350_v5 = vld [vmem:[%s1684_s3 + $0x40] sm:$0xff]  ;;  %v345_v6 = vld [vmem:[%s1684_s3 + $0x18] sm:$0xff]  ;;  %vm654_vm2 = vcmask 1047556   ;;  %vm722_vm3 = vcmask 195584   ;;  %vm724_vm4 = vcmask 261120  }
  0x1a   : > { %v351_v4 = vld [vmem:[%s1684_s3 + $0x48] sm:$0xff]  ;;  %v344_v7 = vld [vmem:[%s1684_s3 + $0x10] sm:$0xff]  ;;  %s1108_s23 = sshll.u32 %s321_s10, 3  ;;  %v353_v9 = vld [vmem:[%s1684_s3 + $0x58] sm:$0xff]  ;;  %vm726_vm5 = vcmask 326656   ;;  %vm728_vm6 = vcmask 392192  }
  0x1b   : > { %373 = vmatpush.msra.mxu2 %v342_v2  ;;  %393 = vmatpush.msra.mxu3 %v343_v3  ;;  %v339_v8 = vld [vmem:[%s1683_s2 + $0x48] sm:$0xff]  ;;  %s327_s26 = scalar_lea.vmem %s1694_s1, %s1108_s23  ;;  %v352_v10 = vld [vmem:[%s1684_s3 + $0x50] sm:$0xff]  ;;  %s323_s10 = scalar_lea.vmem %s1695_s0, %s1108_s23  ;;  %v333_v12 = vld [vmem:[%s1683_s2 + $0x18] sm:$0xff]  ;;  %vm730_vm7 = vcmask 457728   ;;  %vm732_vm8 = vcmask 516096   ;;  %vm866_vm9 = vcmask 1040896  }
  0x1c   : > { %555 = vmatpush.msra.mxu1 %v339_v8  ;;  %v329_v11 = vld [vmem:[%s327_s26] sm:$0xff]  ;;  %v347_v14 = vld [vmem:[%s1684_s3 + $0x28] sm:$0xff]  ;;  %v332_v17 = vld [vmem:[%s1683_s2 + $0x10] sm:$0xff]  ;;  %v1287_v8 = vmov 1983009808   ;;  %s1293_s23 = smov 40  }
  0x1d   : > { %432 = vmatpush.msrb.mxu3 %v351_v4  ;;  %412 = vmatpush.msrb.mxu2 %v350_v5  ;;  %v338_v13 = vld [vmem:[%s1683_s2 + $0x40] sm:$0xff]  ;;  %v337_v18 = vld [vmem:[%s1683_s2 + $0x38] sm:$0xff]  ;;  %v336_v19 = vld [vmem:[%s1683_s2 + $0x30] sm:$0xff]  ;;  %s1294_s26 = smov 48   ;;  %s1001_s22 = sshll.u32 %s319_s19, 4  ;;  %s1002_s22 = int_to_ptr.vmem [resolvable:$true] %s1001_s22 }
  0x1e   : > { %1110 = vmatmul.msk.f32.vlgmr.msra.gmra.mxu2 %vm354_vm0, %v329_v11  ;;  %1111 = vmatmul.msk.f32.vlgmr.msra.gmra.mxu3 %vm354_vm0, %v329_v11  ;;  %v328_v15 = vld [vmem:[%s323_s10] sm:$0xff]  ;;  %v331_v20 = vld [vmem:[%s1683_s2 + $0x8] sm:$0xff]  ;;  %v340_v22 = vld [vmem:[%s1683_s2 + $0x50] sm:$0xff] }
  0x1f   : > { %433 = vmatpush.msrb.mxu3 %v345_v6  ;;  %413 = vmatpush.msrb.mxu2 %v344_v7  ;;  %v346_v16 = vld [vmem:[%s1684_s3 + $0x20] sm:$0xff]  ;;  %v341_v23 = vld [vmem:[%s1683_s2 + $0x58] sm:$0xff]  ;;  %v335_v25 = vld [vmem:[%s1683_s2 + $0x28] sm:$0xff] }
  0x20   : > { %556 = vmatpush.msra.mxu1 %v333_v12  ;;  %535 = vmatpush.msra.mxu0 %v338_v13  ;;  %v330_v21 = vld [vmem:[%s1683_s2] sm:$0xff] }
  0x21   : > { %472 = vmatpush.msra.mxu3 %v353_v9  ;;  %452 = vmatpush.msra.mxu2 %v352_v10  ;;  %v334_v24 = vld [vmem:[%s1683_s2 + $0x20] sm:$0xff]  ;;  %v657_v9 = vunpack.c.l.s4 %v1287_v8  ;;  %v1288_v10 = vmov 1934713408   ;;  %v903_v8 = vld [vmem:[%s1686_s5 + $0x48] sm:$0xff] }
  0x22   : > { %1119 = vmatmul.msk.f32.vlgmr.msra.gmra.mxu1 %vm354_vm0, %v328_v15  ;;  %536 = vmatpush.msra.mxu0 %v332_v17  ;;  %v601_v28 = vld [vmem:[%s1685_s4] sm:$0x3f] }
  0x23   : > { %473 = vmatpush.msra.mxu3 %v347_v14  ;;  %453 = vmatpush.msra.mxu2 %v346_v16  ;;  %v606_v31 = vperm.slane %v601_v28, 3  ;;  %v605_v32 = vperm.slane %v601_v28, 2  ;;  %v603_v41 = vperm.slane %v601_v28, 0  ;;  %v604_v42 = vperm.slane %v601_v28, 1 }
  0x24   : > { %1118 = vmatmul.msk.f32.vlgmr.msra.gmra.mxu0 %vm354_vm0, %v328_v15  ;;  %v608_v49 = vperm.slane %v601_v28, 5  ;;  %v607_v50 = vperm.slane %v601_v28, 4  ;;  %v658_v12 = vunpack.c.0.s8 %v657_v9  ;;  %v918_v9 = vld [vmem:[%s1686_s5 + $0xc0] sm:$0xff] }
  0x26   : > { %1112 = vmatmul.msk.f32.vlgmr.msrb.gmra.mxu2 %vm354_vm0, %v329_v11  ;;  %1113 = vmatmul.msk.f32.vlgmr.msrb.gmra.mxu3 %vm354_vm0, %v329_v11 }
  0x27   : > { %515 = vmatpush.msrb.mxu3 %v337_v18  ;;  %495 = vmatpush.msrb.mxu2 %v336_v19 }
  0x29   : > { %516 = vmatpush.msrb.mxu3 %v331_v20  ;;  %496 = vmatpush.msrb.mxu2 %v330_v21 }
  0x2e   : > { %1114 = vmatmul.msk.f32.vlgmr.msra.gmra.mxu2 %vm354_vm0, %v329_v11  ;;  %1115 = vmatmul.msk.f32.vlgmr.msra.gmra.mxu3 %vm354_vm0, %v329_v11  ;;  %v667_v11 = vunpack.c.l.s4 %v1288_v10  ;;  %v902_v10 = vld [vmem:[%s1686_s5 + $0x40] sm:$0xff] }
  0x2f   : > { %575 = vmatpush.msra.mxu2 %v340_v22  ;;  %595 = vmatpush.msra.mxu3 %v341_v23 }
  0x30   : > { %v668_v16 = vunpack.c.0.s8 %v667_v11  ;;  %v917_v11 = vld [vmem:[%s1686_s5 + $0xb8] sm:$0xff] }
  0x31   : > { %576 = vmatpush.msra.mxu2 %v334_v24  ;;  %596 = vmatpush.msra.mxu3 %v335_v25 }
  0x36   : > { %1116 = vmatmul.msk.f32.vlgmr.msrb.gmra.mxu2 %vm354_vm0, %v328_v15  ;;  %1117 = vmatmul.msk.f32.vlgmr.msrb.gmra.mxu3 %vm354_vm0, %v328_v15 }
  0x3e   : > { %1120 = vmatmul.msk.f32.vlgmr.msra.gmra.mxu2 %vm354_vm0, %v328_v15  ;;  %1121 = vmatmul.msk.f32.vlgmr.msra.gmra.mxu3 %vm354_vm0, %v328_v15 }
  0x9f   : > { %v558_v29 = vpop.f32.mrf.mxu1 }
  0xa1   : > { %v375_v26 = vpop.f32.mrf.mxu2  ;;  %v395_v27 = vpop.f32.mrf.mxu3 }
  0xa2   : > { %v538_v30 = vpop.f32.mrf.mxu0 }
  0xa9   : > { %v415_v33 = vpop.f32.mrf.mxu2  ;;  %v435_v34 = vpop.f32.mrf.mxu3 }
  0xaa   : > { %v559_v35 = vadd.f32 %v558_v29, %v435_v34  ;;  %v539_v36 = vadd.f32 %v538_v30, %v415_v33 }
  0xac   : > { %v618_v37 = vadd.f32 %v606_v31, %v559_v35  ;;  %v617_v38 = vadd.f32 %v605_v32, %v539_v36 }
  0xae   : > { %773 = vmatpush.xpose.msrb.mxu2 %v618_v37  ;;  %636 = vmatpush.xpose.msrb.mxu0 %v617_v38 }
  0xb1   : > { %v455_v39 = vpop.f32.mrf.mxu2  ;;  %v475_v40 = vpop.f32.mrf.mxu3 }
  0xb9   : > { %v498_v43 = vpop.f32.mrf.mxu2  ;;  %v518_v44 = vpop.f32.mrf.mxu3 }
  0xba   : > { %v499_v45 = vadd.f32 %v498_v43, %v375_v26  ;;  %v519_v46 = vadd.f32 %v518_v44, %v395_v27 }
  0xbc   : > { %v615_v47 = vadd.f32 %v603_v41, %v499_v45  ;;  %v616_v48 = vadd.f32 %v604_v42, %v519_v46 }
  0xbe   : > { %637 = vmatmul.f32.vlgmr.msrb.gmra.mxu0 %v615_v47  ;;  %774 = vmatmul.f32.vlgmr.msrb.gmra.mxu2 %v616_v48 }
  0xc1   : > { %v578_v51 = vpop.f32.mrf.mxu2  ;;  %v598_v52 = vpop.f32.mrf.mxu3 }
  0xc2   : > { %v579_v53 = vadd.f32 %v578_v51, %v455_v39  ;;  %v599_v54 = vadd.f32 %v598_v52, %v475_v40 }
  0xc4   : > { %v620_v55 = vadd.f32 %v608_v49, %v599_v54  ;;  %v619_v56 = vadd.f32 %v607_v50, %v579_v53 }
  0xc6   : > { %752 = vmatpush.msrb.mxu1 %v619_v56  ;;  %886 = vmatpush.msrb.mxu3 %v620_v55 }
 0x13b   : > { %v638_v59 = vpop.f32.mrf.mxu0 }
 0x13c   : > { %v642_v60 = vsel %vm641_vm1, %v638_v59, -inf }
 0x141   : > { %v775_v57 = vpop.f32.mrf.mxu2 }
 0x142   : > { %v778_v58 = vsel %vm641_vm1, %v775_v57, -inf }
 0x143   : > { %779 = vmax.xlane.f32.xlu0 %v778_v58 }
 0x14b   : > { %643 = vmax.xlane.f32.xlu0 %v642_v60  ;;  %v909_v60 = vld [vmem:[%s1686_s5 + $0x78] sm:$0xff] }
 0x14c   : > { %930 = vmatpush.msra.mxu0 %v909_v60 }
 0x1b6   : > { %v780_v61 = vpop.xlane.xlu0 %779 }
 0x1b7   : > { %v781_v62 = vsub.f32 %v775_v57, %v780_v61  ;;  %v924_v61 = vld [vmem:[%s1686_s5 + $0xf0] sm:$0xff] }
 0x1b9   : > { %v782_v63 = vmul.f32 1.442695, %v781_v62  ;;  %v908_v62 = vld [vmem:[%s1686_s5 + $0x70] sm:$0xff] }
 0x1ba   : > { %931 = vmatpush.msra.mxu0 %v908_v62 }
 0x1bb   : > { %1183 = vpow2.f32 %v782_v63  ;;  %v923_v63 = vld [vmem:[%s1686_s5 + $0xe8] sm:$0xff] }
 0x1be   : > { %v644_v0 = vpop.xlane.xlu0 %643 }
 0x1bf   : > { %v645_v1 = vsub.f32 %v638_v59, %v644_v0  ;;  %v925_v59 = vld [vmem:[%s1686_s5 + $0xf8] sm:$0xff]  ;;  %v907_v0 = vld [vmem:[%s1686_s5 + $0x68] sm:$0xff] }
 0x1c0   : > { %950 = vmatpush.msra.mxu1 %v925_v59  ;;  %932 = vmatpush.msra.mxu0 %v907_v0 }
 0x1c1   : > { %v1184_v2 = vpop.eup %1183  ;;  %v646_v3 = vmul.f32 1.442695, %v645_v1  ;;  %v922_v1 = vld [vmem:[%s1686_s5 + $0xe0] sm:$0xff] }
 0x1c2   : > { %v784_v4 = vsel %vm641_vm1, %v1184_v2, 0.0  ;;  %951 = vmatpush.msra.mxu1 %v924_v61 }
 0x1c3   : > { %1185 = vpow2.f32 %v646_v3  ;;  %785 = vadd.xlane.f32.xlu1 %v784_v4  ;;  %v921_v3 = vld [vmem:[%s1686_s5 + $0xd8] sm:$0xff] }
 0x1c4   : > { %952 = vmatpush.msra.mxu1 %v923_v63  ;;  %v905_v4 = vld [vmem:[%s1686_s5 + $0x58] sm:$0xff] }
 0x1c6   : > { %953 = vmatpush.msra.mxu1 %v922_v1 }
 0x1c8   : > { %954 = vmatpush.msra.mxu1 %v921_v3 }
 0x1c9   : > { %v1186_v5 = vpop.eup %1185 }
 0x1ca   : > { %v648_v6 = vsel %vm641_vm1, %v1186_v5, 0.0 }
 0x1cb   : > { %649 = vadd.xlane.f32.xlu1 %v648_v6  ;;  %v904_v6 = vld [vmem:[%s1686_s5 + $0x50] sm:$0xff] }
 0x236   : > { %v786_v7 = vpop.xlane.xlu1 %785 }
 0x237   : > { %1187 = vrcp.f32 %v786_v7  ;;  %v919_v7 = vld [vmem:[%s1686_s5 + $0xc8] sm:$0xff] }
 0x23d   : > { %v1188_v13 = vpop.eup %1187 }
 0x23e   : > { %v788_v14 = vmul.f32 %v1188_v13, %v1184_v2  ;;  %v650_v15 = vpop.xlane.xlu1 %649  ;;  %v906_v2 = vld [vmem:[%s1686_s5 + $0x60] sm:$0xff]  ;;  %v916_v13 = vld [vmem:[%s1686_s5 + $0xb0] sm:$0xff] }
 0x23f   : > { %1189 = vrcp.f32 %v650_v15  ;;  %933 = vmatpush.msra.mxu0 %v906_v2  ;;  %v915_v15 = vld [vmem:[%s1686_s5 + $0xa8] sm:$0xff] }
 0x240   : > { %1123 = vmatmul.msk.f32.vlgmr.msrb.gmra.mxu3 %vm641_vm1, %v788_v14  ;;  %v794_v17 = vperm.slane %v788_v14, %v658_v12  ;;  %v789_v18 = vrot.slane %v788_v14, 4  ;;  %v900_v14 = vld [vmem:[%s1686_s5 + $0x30] sm:$0xff] }
 0x241   : > { %934 = vmatpush.msra.mxu0 %v905_v4 }
 0x242   : > { %v1490_v19 = vperm.slane %v794_v17, %v668_v16  ;;  %v799_v20 = vrot.slane %v794_v17, 4  ;;  %v790_v21 = vsel %vm654_vm2, 0.0, %v789_v18  ;;  %v914_v17 = vld [vmem:[%s1686_s5 + $0xa0] sm:$0xff] }
 0x243   : > { %v798_v22 = vperm.slane %v790_v21, %v658_v12  ;;  %935 = vmatpush.msra.mxu0 %v904_v6  ;;  %v898_v18 = vld [vmem:[%s1686_s5 + $0x20] sm:$0xff]  ;;  %v897_v21 = vld [vmem:[%s1686_s5 + $0x18] sm:$0xff] }
 0x244   : > { %v819_v23 = vrot.slane %v1490_v19, 4  ;;  %v800_v24 = vsel %vm654_vm2, 0.0, %v799_v20  ;;  %v913_v20 = vld [vmem:[%s1686_s5 + $0x98] sm:$0xff] }
 0x245   : > { %v1190_v25 = vpop.eup %1189  ;;  %v814_v26 = vperm.slane %v798_v22, %v668_v16  ;;  %v808_v27 = vperm.slane %v800_v24, %v668_v16  ;;  %v809_v48 = vrot.slane %v798_v22, 4  ;;  %936 = vmatpush.msra.mxu0 %v903_v8  ;;  %v912_v22 = vld [vmem:[%s1686_s5 + $0x90] sm:$0xff]  ;;  %v911_v24 = vld [vmem:[%s1686_s5 + $0x88] sm:$0xff] }
 0x246   : > { %v820_v28 = vsel %vm654_vm2, 0.0, %v819_v23  ;;  %v652_v29 = vmul.f32 %v1190_v25, %v1186_v5  ;;  %v920_v5 = vld [vmem:[%s1686_s5 + $0xd0] sm:$0xff] }
 0x247   : > { %828 = vrot.lane.b32.xlu2 %v820_v28, %s1289_s24  ;;  %840 = vrot.lane.b32.xlu1 %v814_v26, %s1290_s25  ;;  %v821_v30 = vrot.slane %v808_v27, 4  ;;  %v823_v45 = vrot.slane %v814_v26, 4  ;;  %v810_v51 = vsel %vm654_vm2, 0.0, %v809_v48  ;;  %v896_v23 = vld [vmem:[%s1686_s5 + $0x10] sm:$0xff]  ;;  %v895_v26 = vld [vmem:[%s1686_s5 + $0x8] sm:$0xff] }
 0x248   : > { %1122 = vmatmul.msk.f32.vlgmr.msrb.gmra.mxu1 %vm641_vm1, %v652_v29  ;;  %v659_v31 = vperm.slane %v652_v29, %v658_v12  ;;  %v653_v32 = vrot.slane %v652_v29, 4  ;;  %v818_v52 = vperm.slane %v810_v51, %v668_v16  ;;  %937 = vmatpush.msra.mxu0 %v902_v10  ;;  %v894_v28 = vld [vmem:[%s1686_s5] sm:$0xff] }
 0x249   : > { %v822_v33 = vsel %vm654_vm2, 0.0, %v821_v30  ;;  %v824_v47 = vsel %vm654_vm2, 0.0, %v823_v45  ;;  %955 = vmatpush.msra.mxu1 %v920_v5 }
 0x24a   : > { %836 = vrot.lane.b32.xlu0 %v822_v33, %s1291_s12  ;;  %v1499_v34 = vperm.slane %v659_v31, %v668_v16  ;;  %v664_v35 = vrot.slane %v659_v31, 4  ;;  %v655_v36 = vsel %vm654_vm2, 0.0, %v653_v32  ;;  %v825_v55 = vrot.slane %v818_v52, 4 }
 0x24b   : > { %v663_v40 = vperm.slane %v655_v36, %v658_v12  ;;  %956 = vmatpush.msra.mxu1 %v919_v7  ;;  %v901_v12 = vld [vmem:[%s1686_s5 + $0x38] sm:$0xff] }
 0x24c   : > { %v665_v37 = vsel %vm654_vm2, 0.0, %v664_v35  ;;  %v684_v38 = vrot.slane %v1499_v34, 4  ;;  %v826_v56 = vsel %vm654_vm2, 0.0, %v825_v55  ;;  %938 = vmatpush.msra.mxu0 %v901_v12 }
 0x24d   : > { %v673_v39 = vperm.slane %v665_v37, %v668_v16  ;;  %v674_v44 = vrot.slane %v663_v40, 4  ;;  %v679_v49 = vperm.slane %v663_v40, %v668_v16  ;;  %957 = vmatpush.msra.mxu1 %v918_v9 }
 0x24e   : > { %v685_v42 = vsel %vm654_vm2, 0.0, %v684_v38  ;;  %939 = vmatpush.msra.mxu0 %v900_v14 }
 0x24f   : > { %832 = vrot.lane.b32.xlu2 %v808_v27, %s1292_s13  ;;  %v686_v41 = vrot.slane %v673_v39, 4  ;;  %v675_v46 = vsel %vm654_vm2, 0.0, %v674_v44  ;;  %v688_v57 = vrot.slane %v679_v49, 4  ;;  %958 = vmatpush.msra.mxu1 %v917_v11  ;;  %v910_v27 = vld [vmem:[%s1686_s5 + $0x80] sm:$0xff] }
 0x250   : > { %v683_v50 = vperm.slane %v675_v46, %v668_v16  ;;  %v899_v16 = vld [vmem:[%s1686_s5 + $0x28] sm:$0xff] }
 0x251   : > { %v687_v43 = vsel %vm654_vm2, 0.0, %v686_v41  ;;  %v689_v58 = vsel %vm654_vm2, 0.0, %v688_v57  ;;  %959 = vmatpush.msra.mxu1 %v916_v13  ;;  %940 = vmatpush.msra.mxu0 %v899_v16 }
 0x252   : > { %693 = vrot.lane.b32.xlu0 %v685_v42, %s1289_s24  ;;  %701 = vrot.lane.b32.xlu1 %v687_v43, %s1291_s12  ;;  %v690_v53 = vrot.slane %v683_v50, 4  ;;  %s1003_s24 = sshll.u32 %s999_s21, 4  ;;  %s1004_s24 = int_to_ptr.hbm [resolvable:$true] %s1003_s24 }
 0x253   : > { %960 = vmatpush.msra.mxu1 %v915_v15  ;;  %941 = vmatpush.msra.mxu0 %v898_v18  ;;  %s1205_s12 = sshra.s32 %s1004_s24, 4  ;;  %s1206_s12 = int_to_ptr.hbm [resolvable:$true] %s1205_s12 }
 0x254   : > { %v691_v54 = vsel %vm654_vm2, 0.0, %v690_v53  ;;  %p1212_p0 = scmp.lt.s32.totalorder %s1206_s12, %s1689_s8 }
 0x255   : > { %961 = vmatpush.msra.mxu1 %v914_v17  ;;  %942 = vmatpush.msra.mxu0 %v897_v21 }
 0x257   : > { %844 = vrot.lane.b32.xlu2 %v824_v47, %s1293_s23  ;;  %962 = vmatpush.msra.mxu1 %v913_v20 }
 0x258   : > { %943 = vmatpush.msra.mxu0 %v896_v23 }
 0x259   : > { %963 = vmatpush.msra.mxu1 %v912_v22 }
 0x25a   : > { %705 = vrot.lane.b32.xlu0 %v679_v49, %s1290_s25  ;;  %713 = vrot.lane.b32.xlu1 %v683_v50, %s1294_s26  ;;  %s977_s25 = scalar_lea.sflag [#allocation6], %s1622_s18 }
 0x25b   : > { %964 = vmatpush.msra.mxu1 %v911_v24  ;;  %944 = vmatpush.msra.mxu0 %v895_v26 }
 0x25d   : > { %965 = vmatpush.msra.mxu1 %v910_v27  ;;  %945 = vmatpush.msra.mxu0 %v894_v28 }
 0x25f   : > { %848 = vrot.lane.b32.xlu2 %v818_v52, %s1294_s26 }
 0x262   : > { %717 = vrot.lane.b32.xlu0 %v691_v54, %s1295_s17 }
 0x267   : > { %852 = vrot.lane.b32.xlu2 %v826_v56, %s1295_s17  ;;  %s1296_s17 = smov 64  }
 0x26f   : > { %697 = vrot.lane.b32.xlu2 %v673_v39, %s1292_s13  ;;  %s1207_s13 = scalar_lea.hbm %s1206_s12, 1 }
 0x270   : > { %p1208_p11 = scmp.ne.s32.totalorder %s1206_s12, %s1207_s13 }
 0x272   : > { %p1209_p12 = pnand %p1208_p11, %p1380_p5 }
 0x274   : > { %p1210_p13 = pneg %p1209_p12 }
 0x277   : > { %709 = vrot.lane.b32.xlu2 %v689_v58, %s1293_s23 }
 0x2a1   : > { %v829_v25 = vpop.permute.xlu2 %828 }
 0x2a2   : > { %v855_v32 = vsel %vm641_vm1, %v1490_v19, %v829_v25 }
 0x2a9   : > { %v833_v29 = vpop.permute.xlu2 %832 }
 0x2aa   : > { %v856_v33 = vsel %vm354_vm0, %v855_v32, %v833_v29 }
 0x2b1   : > { %v845_v30 = vpop.permute.xlu2 %844 }
 0x2b9   : > { %v849_v31 = vpop.permute.xlu2 %848  ;;  %v841_v36 = vpop.permute.xlu1 %840 }
 0x2bc   : > { %v837_v35 = vpop.permute.xlu0 %836 }
 0x2bd   : > { %v857_v37 = vsel %vm722_vm3, %v856_v33, %v837_v35 }
 0x2be   : > { %v858_v38 = vsel %vm724_vm4, %v857_v37, %v841_v36 }
 0x2bf   : > { %v859_v39 = vsel %vm726_vm5, %v858_v38, %v845_v30 }
 0x2c0   : > { %v860_v40 = vsel %vm728_vm6, %v859_v39, %v849_v31 }
 0x2c1   : > { %v853_v41 = vpop.permute.xlu2 %852 }
 0x2c2   : > { %v861_v19 = vsel %vm730_vm7, %v860_v40, %v853_v41 }
 0x2c3   : > { %v888_v42 = vpop.f32.mrf.mxu3  ;;  %863 = vrot.lane.b32.xlu2 %v861_v19, %s1296_s17  ;;  %s1211_s17 = scalar_lea.hbm %s1689_s8, 2 }
 0x2c4   : > { %966 = vmatmul.f32.vlgmr.msra.gmra.mxu1 %v888_v42  ;;  %v694_v43 = vpop.permute.xlu0 %693  ;;  %v702_v45 = vpop.permute.xlu1 %701  ;;  %p1213_p1 = scmp.lt.s32.totalorder %s1211_s17, %s1207_s13 }
 0x2c5   : > { %v754_v44 = vpop.f32.mrf.mxu1  ;;  %v720_v47 = vsel %vm641_vm1, %v1499_v34, %v694_v43 }
 0x2c6   : > { %946 = vmatmul.f32.vlgmr.msra.gmra.mxu0 %v754_v44  ;;  %p1214_p2 = por %p1213_p1, %p1212_p0 }
 0x2c8   : > { %p1215_p3 = pnand %p1214_p2, %p1210_p13 }
 0x2c9   : > { %v698_v46 = vpop.permute.xlu2 %697 }
 0x2ca   : > { %v721_v48 = vsel %vm354_vm0, %v720_v47, %v698_v46 }
 0x2cb   : > { %v723_v50 = vsel %vm722_vm3, %v721_v48, %v702_v45 }
 0x2cc   : > { %v706_v49 = vpop.permute.xlu0 %705  ;;  %v714_v53 = vpop.permute.xlu1 %713 }
 0x2cd   : > { %v725_v51 = vsel %vm724_vm4, %v723_v50, %v706_v49 }
 0x2d1   : > { %v710_v52 = vpop.permute.xlu2 %709 }
 0x2d2   : > { %v727_v54 = vsel %vm726_vm5, %v725_v51, %v710_v52 }
 0x2d3   : > { %v729_v55 = vsel %vm728_vm6, %v727_v54, %v714_v53 }
 0x2d4   : > { %v718_v56 = vpop.permute.xlu0 %717 }
 0x2d5   : > { %v731_v34 = vsel %vm730_vm7, %v729_v55, %v718_v56 }
 0x2d6   : > { %733 = vst.msk [vmem:[%s319_s19] sm:$0x1] %vm732_vm8, %v731_v34 }
 0x31d   : > { %v864_v57 = vpop.permute.xlu2 %863 }
 0x31e   : > { %867 = vst.msk [vmem:[%s319_s19] sm:$0x1] %vm866_vm9, %v864_v57 }
 0x31f   : > { %1218 = shalt.err (!%p1215_p3)
}
 0x320   : > { %1129 = dma.vmem_to_hbm [thread:$0]  (%p1380_p5), %s1002_s22, 16, %s1004_s24, %s977_s25   ;;  %v1182_v58 = vld [vmem:[%s1687_s6] ss:$0 sm:$0xff] }
 0x321   : > { %s1107_s19 = sshll.u32 %s1622_s18, 3  ;;  %s1125_s21 = sshll.u32 %s1363_s9, 3 }
 0x322   : > { %s986_s12 = scalar_lea.hbm %s1688_s7, %s1125_s21  ;;  %s313_s13 = scalar_lea.vmem [#allocation3], %s1107_s19 }
 0x323   : > { %s988_s17 = sshll.u32 %s313_s13, 4  ;;  %s990_s20 = sshll.u32 %s986_s12, 4  ;;  %s989_s17 = int_to_ptr.vmem [resolvable:$true] %s988_s17  ;;  %s991_s20 = int_to_ptr.hbm [resolvable:$true] %s990_s20 }
 0x324   : > { %s972_s9 = scalar_lea.sflag [#allocation4], %s1622_s18  ;;  %s1233_s22 = sshra.s32 %s991_s20, 4  ;;  %s1234_s22 = int_to_ptr.hbm [resolvable:$true] %s1233_s22 }
 0x325   : > { %s1235_s0 = scalar_lea.hbm %s1234_s22, 8  ;;  %s1239_s25 = scalar_lea.hbm %s1688_s7, 16 }
 0x326   : > { %p1236_p4 = scmp.ne.s32.totalorder %s1234_s22, %s1235_s0  ;;  %p1240_p9 = scmp.lt.s32.totalorder %s1234_s22, %s1688_s7 }
 0x327   : > { %p1241_p10 = scmp.lt.s32.totalorder %s1239_s25, %s1235_s0 }
 0x328   : > { %p1237_p7 = pnand %p1236_p4, %p1380_p5 }
 0x329   : > { %p1242_p11 = por %p1241_p10, %p1240_p9 }
 0x32a   : > { %p1238_p8 = pneg %p1237_p7 }
 0x32c   : > { %p1243_p12 = pnand %p1242_p11, %p1238_p8 }
 0x341   : > { %v967_v61 = vpop.f32.mrf.mxu1 }
 0x343   : > { %v947_v59 = vpop.f32.mrf.mxu0 }
 0x344   : > { %v948_v60 = vadd.f32 %v1182_v58, %v947_v59 }
 0x346   : > { %v968_v62 = vadd.f32 %v967_v61, %v948_v60 }
 0x348   : > { %970 = vst.msk [vmem:[%s313_s13] sm:$0xff] %vm724_vm4, %v968_v62 }
 0x349   : > { %1246 = shalt.err (!%p1243_p12)
}
 0x34a   : > { %1128 = dma.vmem_to_hbm [thread:$0]  (%p1380_p5), %s989_s17, 128, %s991_s20, %s972_s9  }
 0x34b PF: > { %p1139_p13 = scmp.ge.s32.totalorder %s1285_s30, 2  ;;  %s1015_s18 = sand.u32 1, %s1273_s27  }
 0x34c   : > { %s1016_s21 = scalar_lea.sflag [#allocation4], %s1015_s18 }
 0x34d   : > { %p1133_p0 = pnand %p1139_p13, %p1384_p6 }
 0x34f   : > { %p1134_p1 = pneg %p1133_p0 }
 0x351   : > { %1264 = dma.done.wait (%p1134_p1), %s1016_s21, 128  }
 0x352   : > { %1266 = vsyncadd (%p1134_p1), %s1016_s21, 4294967168  ;;  %s1026_s23 = scalar_lea.sflag [#allocation6], %s1015_s18 }
 0x353   : > { %1268 = dma.done.wait (%p1134_p1), %s1026_s23, 16  }
 0x354   : > { %1270 = vsyncadd (%p1134_p1), %s1026_s23, 4294967280  ;;  %p22_p5 = scmp.ge.s32.totalorder %s1367_s11, 4   ;;  %s1696_s27 = smov %s1277_s28 }
 0x355   : > { %s1697_s28 = smov %s1281_s29  ;;  %s1698_s29 = smov %s1378_s14 }
 0x356   : > { %s1699_s30 = smov %s1367_s11  ;;  %24 = sbr.rel (!%p22_p5) target bundleno = 8 (0x8), region = 103 }
 0x35b   :  { %1031 = vsyncpa [#allocation4], 1 }
 0x35c   :  { %1033 = vsyncpa [#allocation4 + $0x1], 1 }
 0x35d   :  { %1034 = vsyncpa [#allocation6], 1 }
 0x35e   :  { %1036 = vsyncpa [#allocation6 + $0x1], 1 }

</bundles_post_ra>
